<compile_context>
chip_gen: v7x
topology: tpu7x:2x2x1
jax: 0.10.0
libtpu: 0.0.40
codegen_flags: <defaults>
</compile_context>

<pallas_src>
import numpy as np
import jax
import jax.numpy as jnp
from jax.experimental import pallas as pl
from jax.experimental.pallas import tpu as pltpu

# ---- module hyper-parameters (from __init__ defaults, small spatial size) ----
NC = 4                 # input channels
NF = 32                # feature width
NK = 5                 # conv kernel size
NUM_VERTICES = 642
V3 = NUM_VERTICES * 3  # 1926
AZI_SCOPE = 360.0
ELEV_MIN, ELEV_MAX = 0.0, 30.0     # elev_range='0-30'
DIST_MIN, DIST_MAX = 2.0, 6.0      # dist_range='2-6'
CONV_STRIDE = 2
CONV_PAD = NK // 2

# ---- padded / fused layout constants ----
K_RAW = NC * NK * NK                       # 100 (NOT padded in HBM)
V3PAD = ((V3 + 127) // 128) * 128          # 2048, lane-aligned shape-head width
CAM_W = 6
LIGHT_W = 9
SMALL_W = 128                              # cam(6)|light(9)|tex(NF)|zeros, lane-aligned
HEADS_W = V3PAD + SMALL_W                  # fused head-matmul output width
CAM_OFF = 0
LIGHT_OFF = CAM_W
TEX_OFF = CAM_W + LIGHT_W
assert CAM_W + LIGHT_W + NF <= SMALL_W, "packed small-head slab overflow"


def attribute_encoder_kernel(patches_ref, w_conv_ref, b_conv_ref,
                             w_heads_ref, b_heads_ref,
                             v_init_ref, cam_const_ref,
                             delta_ref, verts_ref, small_ref):
    # ---- shared conv backbone (im2col matmul) + ReLU + global pool ----
    patches = patches_ref[0]                                  # (TB, P, K_RAW) bf16
    TB, P, K = patches.shape
    feat = jnp.dot(patches.reshape(TB * P, K), w_conv_ref[...],
                   preferred_element_type=jnp.float32)        # (TB*P, NF) f32
    feat = jnp.maximum(feat + b_conv_ref[...], 0.0)
    # 1/P of the average pool is folded into w_heads host-side -> plain sum.
    pooled = jnp.sum(feat.reshape(TB, P, NF), axis=1)         # (TB, NF) f32

    # ---- single fused head matmul: [shape | cam | light | tex] ----
    heads = jnp.dot(pooled.astype(jnp.bfloat16), w_heads_ref[...],
                    preferred_element_type=jnp.float32) + b_heads_ref[...]
    shape_raw = heads[:, :V3PAD]                              # lane-aligned slice
    small_raw = heads[:, V3PAD:]                              # (TB, 128)

    # shape head: delta vertices, then vertices = vertices_init + delta
    delta = jnp.tanh(shape_raw) * 0.1
    delta_ref[0] = delta.astype(delta_ref.dtype)              # bf16 writeback
    verts_ref[0] = (v_init_ref[...] + delta).astype(verts_ref.dtype)

    # camera / light / texture head epilogue with precomputed per-column
    # scale / offset / selector constants (no per-step iota / where chains).
    cc = cam_const_ref[...]
    scale, offset = cc[0:1, :], cc[1:2, :]
    sel_sig, sel_tanh, sel_id = cc[2:3, :], cc[3:4, :], cc[4:5, :]
    small_ref[0] = (sel_sig * (offset + scale * jax.nn.sigmoid(small_raw))
                    + sel_tanh * jnp.tanh(small_raw)
                    + sel_id * small_raw)


def im2col_nchw(x, k, stride, pad):
    """(B, C, H, W) -> (B, H_out*W_out, C*k*k) patches (no K padding)."""
    B, C, H, W = x.shape
    xp = jnp.pad(x, ((0, 0), (0, 0), (pad, pad), (pad, pad)))
    Ho = (H + 2 * pad - k) // stride + 1
    Wo = (W + 2 * pad - k) // stride + 1
    cols = []
    for i in range(k):
        for j in range(k):
            cols.append(xp[:, :, i:i + stride * Ho:stride, j:j + stride * Wo:stride])
    patches = jnp.stack(cols, axis=2)                      # (B, C, k*k, Ho, Wo)
    patches = patches.transpose(0, 3, 4, 1, 2).reshape(B, Ho * Wo, C * k * k)
    return patches


def init_params(key):
    ks = jax.random.split(key, 6)
    f32 = jnp.float32

    def w(k, shape, scale):
        return jax.random.normal(k, shape, f32) * scale

    return dict(
        w_conv=w(ks[0], (K_RAW, NF), 0.1),  b_conv=jnp.zeros((1, NF), f32),
        w_shape=w(ks[1], (NF, V3), 0.05),   b_shape=jnp.zeros((1, V3), f32),
        w_cam=w(ks[2], (NF, CAM_W), 0.1),   b_cam=jnp.zeros((1, CAM_W), f32),
        w_tex=w(ks[3], (NF, NF), 0.1),      b_tex=jnp.zeros((1, NF), f32),
        w_light=w(ks[4], (NF, LIGHT_W), 0.1), b_light=jnp.zeros((1, LIGHT_W), f32),
        vertices_init=w(ks[5], (NUM_VERTICES, 3), 1.0),
    )


def prepare_fused_params(params, pool_size):
    """Pad / fuse the per-head weights into lane-aligned matmul operands.

    The 1/pool_size of the global average pool is folded into w_heads so the
    kernel only needs a sum over patches.
    """
    f32 = jnp.float32
    w_conv = params['w_conv'].astype(f32)                 # (K_RAW, NF), no padding
    b_conv = params['b_conv'].reshape(1, NF).astype(f32)

    inv_p = 1.0 / float(pool_size)
    w_heads = jnp.zeros((NF, HEADS_W), f32)
    w_heads = w_heads.at[:, :V3].set(params['w_shape'])
    w_heads = w_heads.at[:, V3PAD + CAM_OFF:V3PAD + CAM_OFF + CAM_W].set(params['w_cam'])
    w_heads = w_heads.at[:, V3PAD + LIGHT_OFF:V3PAD + LIGHT_OFF + LIGHT_W].set(params['w_light'])
    w_heads = w_heads.at[:, V3PAD + TEX_OFF:V3PAD + TEX_OFF + NF].set(params['w_tex'])
    w_heads = w_heads * inv_p                              # fold mean-pool scale

    b_heads = jnp.zeros((1, HEADS_W), f32)
    b_heads = b_heads.at[:, :V3].set(params['b_shape'])
    b_heads = b_heads.at[:, V3PAD + CAM_OFF:V3PAD + CAM_OFF + CAM_W].set(params['b_cam'])
    b_heads = b_heads.at[:, V3PAD + LIGHT_OFF:V3PAD + LIGHT_OFF + LIGHT_W].set(params['b_light'])
    b_heads = b_heads.at[:, V3PAD + TEX_OFF:V3PAD + TEX_OFF + NF].set(params['b_tex'])

    v_init = jnp.zeros((1, V3PAD), f32).at[:, :V3].set(
        params['vertices_init'].reshape(1, V3))

    # rows: 0 scale, 1 offset, 2 sigmoid-select, 3 tanh-select, 4 identity-select
    cam_const = np.zeros((8, SMALL_W), np.float32)
    cam_const[0, 0:3] = [AZI_SCOPE, ELEV_MAX - ELEV_MIN, DIST_MAX - DIST_MIN]
    cam_const[1, 0:3] = [0.0, ELEV_MIN, DIST_MIN]
    cam_const[2, 0:3] = 1.0                                  # azi/elev/dist squash
    cam_const[3, 3:6] = 1.0                                  # camera translation biases
    cam_const[3, TEX_OFF:TEX_OFF + NF] = 1.0                 # textures (tanh)
    cam_const[4, LIGHT_OFF:LIGHT_OFF + LIGHT_W] = 1.0        # lights (identity)

    return dict(
        w_conv=w_conv.astype(jnp.bfloat16),
        b_conv=b_conv,
        w_heads=w_heads.astype(jnp.bfloat16),
        b_heads=b_heads,
        v_init=v_init,
        cam_const=jnp.asarray(cam_const),
    )


def _tpu_generation():
    """(two_tensorcores_per_chip, small_physical_vmem) — v7x vs v5e/v6e."""
    try:
        kind = jax.devices()[0].device_kind.lower()
    except Exception:
        kind = ""
    is_v7 = "7" in kind
    return is_v7, is_v7


def _choose_tiling(batch, num_patches):
    """tb (multiple of 8), num_tiles, vmem_limit — VMEM-budget + generation aware."""
    two_tc, small_vmem = _tpu_generation()
    # Working-set budget: leave headroom under the scoped VMEM limit
    # (v7x: 64 MiB physical / 32 MiB default scope; v5e/v6e: 128 MiB physical).
    budget = (20 if small_vmem else 48) * (1 << 20)
    budget -= 1 << 20                                        # resident weights / slack
    # Per-batch-row VMEM bytes:
    per_row = (2 * num_patches * 128 * 2                     # patches bf16, x2 buffers
               + 2 * 2 * V3PAD * 2                           # delta+verts bf16, x2 buffers
               + 2 * SMALL_W * 4                             # small f32, x2 buffers
               + (num_patches * 128 * 4 * 5) // 4            # conv feat f32 (+25% slack)
               + HEADS_W * 4 * 3)                            # head acts f32 + temporaries
    tb_cap = max(8, (budget // per_row) // 8 * 8)

    b8 = ((batch + 7) // 8) * 8
    # Single-TC chips (v5e/v6e): one tile whenever it fits -> no per-step overhead.
    # v7x: at least 2 (and an even number of) tiles so both TensorCores get work.
    min_tiles = 2 if (two_tc and b8 >= 16) else 1
    num_tiles = max(min_tiles, -(-b8 // tb_cap))
    if two_tc and num_tiles > 1 and num_tiles % 2 == 1:
        num_tiles += 1
    tb = ((-(-b8 // num_tiles)) + 7) // 8 * 8

    vmem_limit = (40 if small_vmem else 64) * (1 << 20)
    return tb, num_tiles, vmem_limit


def attribute_encoder_forward(input_img, params, batch_tile=None):
    B = input_img.shape[0]
    patches = im2col_nchw(input_img.astype(jnp.float32), NK, CONV_STRIDE, CONV_PAD)
    P = patches.shape[1]

    if batch_tile is None:
        tb, num_tiles, vmem_limit = _choose_tiling(B, P)
    else:
        tb = max(8, ((batch_tile + 7) // 8) * 8)
        num_tiles = -(-B // tb)
        vmem_limit = 64 << 20
    b_pad = tb * num_tiles

    if b_pad > B:
        patches = jnp.pad(patches, ((0, b_pad - B), (0, 0), (0, 0)))
    patches = patches.reshape(num_tiles, tb, P, K_RAW).astype(jnp.bfloat16)

    fused = prepare_fused_params(params, P)
    weight_args = (fused['w_conv'], fused['b_conv'], fused['w_heads'],
                   fused['b_heads'], fused['v_init'], fused['cam_const'])

    def resident(a):
        # Constant index map: block index never changes, so the weight is
        # DMA'd to VMEM once and stays resident for all grid steps.
        return pl.BlockSpec(a.shape, lambda t, n=a.ndim: (0,) * n)

    in_specs = [pl.BlockSpec((1, tb, P, K_RAW), lambda t: (t, 0, 0, 0))] + \
               [resident(a) for a in weight_args]

    out_shape = (
        jax.ShapeDtypeStruct((num_tiles, tb, V3PAD), jnp.bfloat16),   # delta (padded)
        jax.ShapeDtypeStruct((num_tiles, tb, V3PAD), jnp.bfloat16),   # vertices (padded)
        jax.ShapeDtypeStruct((num_tiles, tb, SMALL_W), jnp.float32),  # cam|light|tex packed
    )
    out_specs = (
        pl.BlockSpec((1, tb, V3PAD), lambda t: (t, 0, 0)),
        pl.BlockSpec((1, tb, V3PAD), lambda t: (t, 0, 0)),
        pl.BlockSpec((1, tb, SMALL_W), lambda t: (t, 0, 0)),
    )

    delta_p, verts_p, small_p = pl.pallas_call(
        attribute_encoder_kernel,
        out_shape=out_shape,
        grid=(num_tiles,),
        in_specs=in_specs,
        out_specs=out_specs,
        compiler_params=pltpu.CompilerParams(
            dimension_semantics=("parallel",),
            vmem_limit_bytes=vmem_limit),
    )(patches, *weight_args)

    # delta / vertices stay bf16 (documented ~1e-2 relative drift vs f32).
    delta = delta_p.reshape(b_pad, V3PAD)[:B, :V3].reshape(B, NUM_VERTICES, 3)
    verts = verts_p.reshape(b_pad, V3PAD)[:B, :V3].reshape(B, NUM_VERTICES, 3)
    small = small_p.reshape(b_pad, SMALL_W)[:B]

    attributes = {
        'azimuths': small[:, CAM_OFF + 0],
        'elevations': small[:, CAM_OFF + 1],
        'distances': small[:, CAM_OFF + 2],
        'biases': small[:, CAM_OFF + 3:CAM_OFF + 6],
        'vertices': verts,
        'delta_vertices': delta,
        'textures': small[:, TEX_OFF:TEX_OFF + NF],
        'lights': small[:, LIGHT_OFF:LIGHT_OFF + LIGHT_W],
        'img_feats': None,
        'bg': None,   # bg=False path
    }
    return attributes


if __name__ == "__main__":
    key = jax.random.PRNGKey(0)
    k_img, k_par = jax.random.split(key)
    B, H, W = 2, 16, 16
    input_img = jax.random.normal(k_img, (B, NC, H, W), jnp.float32)
    params = init_params(k_par)

    attrs = attribute_encoder_forward(input_img, params)
    jax.block_until_ready(attrs['vertices'])

    # light sanity checks
    assert attrs['vertices'].shape == (B, NUM_VERTICES, 3)
    assert attrs['delta_vertices'].shape == (B, NUM_VERTICES, 3)
    assert attrs['azimuths'].shape == (B,)
    assert attrs['biases'].shape == (B, 3)
    assert attrs['textures'].shape == (B, NF)
    assert attrs['lights'].shape == (B, 9)
    # vertices must equal vertices_init + delta_vertices (bf16 outputs -> loose tol)
    recon = params['vertices_init'][None] + attrs['delta_vertices'].astype(jnp.float32)
    assert jnp.allclose(recon, attrs['vertices'].astype(jnp.float32),
                        atol=3e-2, rtol=2e-2)
    # camera range squashing
    assert bool(jnp.all((attrs['azimuths'] >= 0.0) & (attrs['azimuths'] <= AZI_SCOPE)))
    assert bool(jnp.all((attrs['elevations'] >= ELEV_MIN) & (attrs['elevations'] <= ELEV_MAX)))
    assert bool(jnp.all((attrs['distances'] >= DIST_MIN) & (attrs['distances'] <= DIST_MAX)))

    print("KERNEL_OK")
</pallas_src>

<mosaic_0001>
module attributes {stable_mosaic.version = 11 : i64} {
  func.func @attribute_encoder_kernel(%arg0: i32, %arg1: memref<1x8x64x100xbf16, #tpu.memory_space<vmem>>, %arg2: memref<100x32xbf16, #tpu.memory_space<vmem>>, %arg3: memref<1x32xf32, #tpu.memory_space<vmem>>, %arg4: memref<32x2176xbf16, #tpu.memory_space<vmem>>, %arg5: memref<1x2176xf32, #tpu.memory_space<vmem>>, %arg6: memref<1x2048xf32, #tpu.memory_space<vmem>>, %arg7: memref<8x128xf32, #tpu.memory_space<vmem>>, %arg8: memref<1x8x2048xbf16, #tpu.memory_space<vmem>>, %arg9: memref<1x8x2048xbf16, #tpu.memory_space<vmem>>, %arg10: memref<1x8x128xf32, #tpu.memory_space<vmem>>) attributes {dimension_semantics = [#tpu.dimension_semantics<parallel>], iteration_bounds = array<i64: 1>, scalar_prefetch = 0 : i64, scratch_operands = 0 : i64, tpu.core_type = #tpu.core_type<tc>, window_params = [{transform_indices = @transform_0, window_bounds = array<i64: 1, 8, 64, 100>}, {pipeline_mode = #tpu.pipeline_mode<synchronous>, transform_indices = @transform_1, window_bounds = array<i64: 100, 32>}, {pipeline_mode = #tpu.pipeline_mode<synchronous>, transform_indices = @transform_2, window_bounds = array<i64: 1, 32>}, {pipeline_mode = #tpu.pipeline_mode<synchronous>, transform_indices = @transform_3, window_bounds = array<i64: 32, 2176>}, {pipeline_mode = #tpu.pipeline_mode<synchronous>, transform_indices = @transform_4, window_bounds = array<i64: 1, 2176>}, {pipeline_mode = #tpu.pipeline_mode<synchronous>, transform_indices = @transform_5, window_bounds = array<i64: 1, 2048>}, {pipeline_mode = #tpu.pipeline_mode<synchronous>, transform_indices = @transform_6, window_bounds = array<i64: 8, 128>}, {transform_indices = @transform_7, window_bounds = array<i64: 1, 8, 2048>}, {transform_indices = @transform_8, window_bounds = array<i64: 1, 8, 2048>}, {transform_indices = @transform_9, window_bounds = array<i64: 1, 8, 128>}]} {
    %c0 = arith.constant 0 : index
    %c0_0 = arith.constant 0 : index
    %c0_1 = arith.constant 0 : index
    %c0_2 = arith.constant 0 : index
    %0 = vector.load %arg1[%c0, %c0_0, %c0_1, %c0_2] : memref<1x8x64x100xbf16, #tpu.memory_space<vmem>>, vector<1x8x64x100xbf16>
    %1 = vector.shape_cast %0 : vector<1x8x64x100xbf16> to vector<8x64x100xbf16>
    %2 = vector.shape_cast %1 : vector<8x64x100xbf16> to vector<512x100xbf16>
    %c0_3 = arith.constant 0 : index
    %c0_4 = arith.constant 0 : index
    %3 = vector.load %arg2[%c0_3, %c0_4] : memref<100x32xbf16, #tpu.memory_space<vmem>>, vector<100x32xbf16>
    %cst = arith.constant dense<0.000000e+00> : vector<512x32xf32>
    %4 = tpu.matmul %2, %3, %cst {dimension_numbers = #tpu.dot_dimension_numbers<[1], [0], [0], [1], [0, 0, 1, 1], [], []>} : vector<512x100xbf16>, vector<100x32xbf16>, vector<512x32xf32> -> vector<512x32xf32>
    %c0_5 = arith.constant 0 : index
    %c0_6 = arith.constant 0 : index
    %5 = vector.load %arg3[%c0_5, %c0_6] : memref<1x32xf32, #tpu.memory_space<vmem>>, vector<1x32xf32>
    %6 = vector.broadcast %5 : vector<1x32xf32> to vector<512x32xf32>
    %7 = arith.addf %4, %6 : vector<512x32xf32>
    %cst_7 = arith.constant 0.000000e+00 : f32
    %8 = vector.broadcast %cst_7 : f32 to vector<512x32xf32>
    %9 = arith.maximumf %7, %8 : vector<512x32xf32>
    %10 = vector.shape_cast %9 : vector<512x32xf32> to vector<8x64x32xf32>
    %cst_8 = arith.constant dense<0.000000e+00> : vector<8x32xf32>
    %11 = vector.multi_reduction <add>, %10, %cst_8 [1] : vector<8x64x32xf32> to vector<8x32xf32>
    %12 = arith.truncf %11 : vector<8x32xf32> to vector<8x32xbf16>
    %c0_9 = arith.constant 0 : index
    %c0_10 = arith.constant 0 : index
    %13 = vector.load %arg4[%c0_9, %c0_10] : memref<32x2176xbf16, #tpu.memory_space<vmem>>, vector<32x2176xbf16>
    %cst_11 = arith.constant dense<0.000000e+00> : vector<8x2176xf32>
    %14 = tpu.matmul %12, %13, %cst_11 {dimension_numbers = #tpu.dot_dimension_numbers<[1], [0], [0], [1], [0, 0, 1, 1], [], []>} : vector<8x32xbf16>, vector<32x2176xbf16>, vector<8x2176xf32> -> vector<8x2176xf32>
    %c0_12 = arith.constant 0 : index
    %c0_13 = arith.constant 0 : index
    %15 = vector.load %arg5[%c0_12, %c0_13] : memref<1x2176xf32, #tpu.memory_space<vmem>>, vector<1x2176xf32>
    %16 = vector.broadcast %15 : vector<1x2176xf32> to vector<8x2176xf32>
    %17 = arith.addf %14, %16 : vector<8x2176xf32>
    %18 = vector.extract_strided_slice %17 {offsets = [0, 0], sizes = [8, 2048], strides = [1, 1]} : vector<8x2176xf32> to vector<8x2048xf32>
    %19 = vector.extract_strided_slice %17 {offsets = [0, 2048], sizes = [8, 128], strides = [1, 1]} : vector<8x2176xf32> to vector<8x128xf32>
    %20 = math.tanh %18 : vector<8x2048xf32>
    %cst_14 = arith.constant 1.000000e-01 : f32
    %21 = vector.broadcast %cst_14 : f32 to vector<8x2048xf32>
    %22 = arith.mulf %20, %21 : vector<8x2048xf32>
    %23 = arith.truncf %22 : vector<8x2048xf32> to vector<8x2048xbf16>
    %c0_15 = arith.constant 0 : index
    %c0_16 = arith.constant 0 : index
    %c0_17 = arith.constant 0 : index
    %24 = vector.load %arg8[%c0_15, %c0_16, %c0_17] : memref<1x8x2048xbf16, #tpu.memory_space<vmem>>, vector<1x8x2048xbf16>
    %25 = vector.shape_cast %24 : vector<1x8x2048xbf16> to vector<8x2048xbf16>
    %26 = vector.shape_cast %23 : vector<8x2048xbf16> to vector<1x8x2048xbf16>
    tpu.vector_store %arg8[%c0_15, %c0_16, %c0_17], %26 {strides = array<i32>} : memref<1x8x2048xbf16, #tpu.memory_space<vmem>>, vector<1x8x2048xbf16>,
    %c0_18 = arith.constant 0 : index
    %c0_19 = arith.constant 0 : index
    %27 = vector.load %arg6[%c0_18, %c0_19] : memref<1x2048xf32, #tpu.memory_space<vmem>>, vector<1x2048xf32>
    %28 = vector.broadcast %27 : vector<1x2048xf32> to vector<8x2048xf32>
    %29 = arith.addf %28, %22 : vector<8x2048xf32>
    %30 = arith.truncf %29 : vector<8x2048xf32> to vector<8x2048xbf16>
    %c0_20 = arith.constant 0 : index
    %c0_21 = arith.constant 0 : index
    %c0_22 = arith.constant 0 : index
    %31 = vector.load %arg9[%c0_20, %c0_21, %c0_22] : memref<1x8x2048xbf16, #tpu.memory_space<vmem>>, vector<1x8x2048xbf16>
    %32 = vector.shape_cast %31 : vector<1x8x2048xbf16> to vector<8x2048xbf16>
    %33 = vector.shape_cast %30 : vector<8x2048xbf16> to vector<1x8x2048xbf16>
    tpu.vector_store %arg9[%c0_20, %c0_21, %c0_22], %33 {strides = array<i32>} : memref<1x8x2048xbf16, #tpu.memory_space<vmem>>, vector<1x8x2048xbf16>,
    %c0_23 = arith.constant 0 : index
    %c0_24 = arith.constant 0 : index
    %34 = vector.load %arg7[%c0_23, %c0_24] : memref<8x128xf32, #tpu.memory_space<vmem>>, vector<8x128xf32>
    %35 = vector.extract_strided_slice %34 {offsets = [0, 0], sizes = [1, 128], strides = [1, 1]} : vector<8x128xf32> to vector<1x128xf32>
    %36 = vector.extract_strided_slice %34 {offsets = [1, 0], sizes = [1, 128], strides = [1, 1]} : vector<8x128xf32> to vector<1x128xf32>
    %37 = vector.extract_strided_slice %34 {offsets = [2, 0], sizes = [1, 128], strides = [1, 1]} : vector<8x128xf32> to vector<1x128xf32>
    %38 = vector.extract_strided_slice %34 {offsets = [3, 0], sizes = [1, 128], strides = [1, 1]} : vector<8x128xf32> to vector<1x128xf32>
    %39 = vector.extract_strided_slice %34 {offsets = [4, 0], sizes = [1, 128], strides = [1, 1]} : vector<8x128xf32> to vector<1x128xf32>
    %40 = arith.negf %19 : vector<8x128xf32>
    %41 = math.exp %40 : vector<8x128xf32>
    %cst_25 = arith.constant 1.000000e+00 : f32
    %42 = vector.broadcast %cst_25 : f32 to vector<8x128xf32>
    %43 = arith.addf %42, %41 : vector<8x128xf32>
    %44 = arith.divf %42, %43 : vector<8x128xf32>
    %45 = vector.broadcast %35 : vector<1x128xf32> to vector<8x128xf32>
    %46 = arith.mulf %45, %44 : vector<8x128xf32>
    %47 = vector.broadcast %36 : vector<1x128xf32> to vector<8x128xf32>
    %48 = arith.addf %47, %46 : vector<8x128xf32>
    %49 = vector.broadcast %37 : vector<1x128xf32> to vector<8x128xf32>
    %50 = arith.mulf %49, %48 : vector<8x128xf32>
    %51 = math.tanh %19 : vector<8x128xf32>
    %52 = vector.broadcast %38 : vector<1x128xf32> to vector<8x128xf32>
    %53 = arith.mulf %52, %51 : vector<8x128xf32>
    %54 = arith.addf %50, %53 : vector<8x128xf32>
    %55 = vector.broadcast %39 : vector<1x128xf32> to vector<8x128xf32>
    %56 = arith.mulf %55, %19 : vector<8x128xf32>
    %57 = arith.addf %54, %56 : vector<8x128xf32>
    %c0_26 = arith.constant 0 : index
    %c0_27 = arith.constant 0 : index
    %c0_28 = arith.constant 0 : index
    %58 = vector.load %arg10[%c0_26, %c0_27, %c0_28] : memref<1x8x128xf32, #tpu.memory_space<vmem>>, vector<1x8x128xf32>
    %59 = vector.shape_cast %58 : vector<1x8x128xf32> to vector<8x128xf32>
    %60 = vector.shape_cast %57 : vector<8x128xf32> to vector<1x8x128xf32>
    tpu.vector_store %arg10[%c0_26, %c0_27, %c0_28], %60 {strides = array<i32>} : memref<1x8x128xf32, #tpu.memory_space<vmem>>, vector<1x8x128xf32>,
    return
  }
  func.func @transform_0(%arg0: i32) -> (i32, i32, i32, i32) {
    %c0_i32 = arith.constant 0 : i32
    %c0_i32_0 = arith.constant 0 : i32
    %c0_i32_1 = arith.constant 0 : i32
    %c0_i32_2 = arith.constant 0 : i32
    return %arg0, %c0_i32, %c0_i32_0, %c0_i32_1 : i32, i32, i32, i32
  }
  func.func @transform_1(%arg0: i32) -> (i32, i32) {
    %c0_i32 = arith.constant 0 : i32
    %c0_i32_0 = arith.constant 0 : i32
    %c0_i32_1 = arith.constant 0 : i32
    return %c0_i32, %c0_i32_0 : i32, i32
  }
  func.func @transform_2(%arg0: i32) -> (i32, i32) {
    %c0_i32 = arith.constant 0 : i32
    %c0_i32_0 = arith.constant 0 : i32
    %c0_i32_1 = arith.constant 0 : i32
    return %c0_i32, %c0_i32_0 : i32, i32
  }
  func.func @transform_3(%arg0: i32) -> (i32, i32) {
    %c0_i32 = arith.constant 0 : i32
    %c0_i32_0 = arith.constant 0 : i32
    %c0_i32_1 = arith.constant 0 : i32
    return %c0_i32, %c0_i32_0 : i32, i32
  }
  func.func @transform_4(%arg0: i32) -> (i32, i32) {
    %c0_i32 = arith.constant 0 : i32
    %c0_i32_0 = arith.constant 0 : i32
    %c0_i32_1 = arith.constant 0 : i32
    return %c0_i32, %c0_i32_0 : i32, i32
  }
  func.func @transform_5(%arg0: i32) -> (i32, i32) {
    %c0_i32 = arith.constant 0 : i32
    %c0_i32_0 = arith.constant 0 : i32
    %c0_i32_1 = arith.constant 0 : i32
    return %c0_i32, %c0_i32_0 : i32, i32
  }
  func.func @transform_6(%arg0: i32) -> (i32, i32) {
    %c0_i32 = arith.constant 0 : i32
    %c0_i32_0 = arith.constant 0 : i32
    %c0_i32_1 = arith.constant 0 : i32
    return %c0_i32, %c0_i32_0 : i32, i32
  }
  func.func @transform_7(%arg0: i32) -> (i32, i32, i32) {
    %c0_i32 = arith.constant 0 : i32
    %c0_i32_0 = arith.constant 0 : i32
    %c0_i32_1 = arith.constant 0 : i32
    return %arg0, %c0_i32, %c0_i32_0 : i32, i32, i32
  }
  func.func @transform_8(%arg0: i32) -> (i32, i32, i32) {
    %c0_i32 = arith.constant 0 : i32
    %c0_i32_0 = arith.constant 0 : i32
    %c0_i32_1 = arith.constant 0 : i32
    return %arg0, %c0_i32, %c0_i32_0 : i32, i32, i32
  }
  func.func @transform_9(%arg0: i32) -> (i32, i32, i32) {
    %c0_i32 = arith.constant 0 : i32
    %c0_i32_0 = arith.constant 0 : i32
    %c0_i32_1 = arith.constant 0 : i32
    return %arg0, %c0_i32, %c0_i32_0 : i32, i32, i32
  }
}

</mosaic_0001>

<bundles_post_ra>
// kernel: tpu_custom_call.1
= control target key start
LH: loop header
LB: loop body
LE: loop exit
PB: predicated region body
PF: predicated region fallthrough
CT: control target
= control target key end

     0   :  { %15 = vsyncpa [#allocation3], 0  ;;  %s3276_s0 = inlined_call_operand.hbm [shape: bf16[1,8,64,100], index: 0, kind: input, shape index: {}]   ;;  %s3277_s1 = inlined_call_operand.hbm [shape: bf16[100,32], index: 1, kind: input, shape index: {}]   ;;  %s3278_s2 = inlined_call_operand.hbm [shape: f32[1,32], index: 2, kind: input, shape index: {}]   ;;  %s3279_s3 = inlined_call_operand.hbm [shape: bf16[32,2176], index: 3, kind: input, shape index: {}]   ;;  %s3280_s4 = inlined_call_operand.hbm [shape: f32[1,2176], index: 4, kind: input, shape index: {}]   ;;  %s3281_s5 = inlined_call_operand.hbm [shape: f32[1,2048], index: 5, kind: input, shape index: {}]   ;;  %s3282_s6 = inlined_call_operand.hbm [shape: f32[8,128], index: 6, kind: input, shape index: {}]   ;;  %s3283_s7 = inlined_call_operand.hbm [shape: bf16[1,8,2048], index: 7, kind: output, shape index: {0}]   ;;  %s3284_s8 = inlined_call_operand.hbm [shape: bf16[1,8,2048], index: 8, kind: output, shape index: {1}]   ;;  %s3285_s9 = inlined_call_operand.hbm [shape: f32[1,8,128], index: 9, kind: output, shape index: {2}]  }
   0x1   :  { %16 = vsyncpa [#allocation6], 0 }
   0x2   :  { %17 = vsyncpa [#allocation9], 0 }
   0x3   :  { %18 = vsyncpa [#allocation12], 0 }
   0x4   :  { %19 = vsyncpa [#allocation4], 0 }
   0x5   :  { %20 = vsyncpa [#allocation16], 0  ;;  %s2760_s30 = smov [#allocation5]   ;;  %s2761_s11 = smov [#allocation8]  }
   0x6   :  { %s38_s10 = sshll.u32 %s2760_s30, 4  ;;  %s60_s12 = sshll.u32 %s2761_s11, 4  ;;  %s39_s10 = int_to_ptr.vmem [resolvable:$true] %s38_s10  ;;  %s2827_s12 = int_to_ptr.vmem [resolvable:$true] %s60_s12 }
   0x7   :  { %s2528_s15 = scalar_lea.hbm %s3277_s1, 832 }
   0x8   :  { %p2529_p0 = scmp.ne.s32.totalorder %s3277_s1, %s2528_s15  ;;  %p2532_p1 = scmp.lt.u32.totalorder %s2528_s15, %s3277_s1 }
   0xa   :  { %p2534_p2 = pnand %p2532_p1, %p2529_p0 }
   0xc   :  { %2537 = shalt.err (!%p2534_p2)
}
   0xd   :  { %s2538_s20 = scalar_lea.vmem %s39_s10, 832  ;;  %p2543_p4 = scmp.lt.s32.totalorder %s39_s10, %s39_s10 }
   0xe   :  { %p2539_p3 = scmp.ne.s32.totalorder %s39_s10, %s2538_s20  ;;  %p2544_p5 = scmp.lt.s32.totalorder %s2538_s20, %s2538_s20 }
  0x10   :  { %p2545_p6 = por %p2544_p5, %p2543_p4 }
  0x12   :  { %p2546_p7 = pnand %p2545_p6, %p2539_p3 }
  0x14   :  { %2549 = shalt.err (!%p2546_p7)
}
  0x15   :  { %s2762_s21 = smov 64   ;;  %s2763_s22 = smov 4  }
  0x16   :  { %44 = dma.hbm_to_vmem [thread:$0]  %s3277_s1, 832, %s39_s10, [#allocation6], %s2762_s21, %s2762_s21, %s2763_s22  }
  0x17   :  { %s2550_s27 = scalar_lea.hbm %s3279_s3, 4352 }
  0x18   :  { %p2551_p8 = scmp.ne.s32.totalorder %s3279_s3, %s2550_s27  ;;  %p2554_p9 = scmp.lt.u32.totalorder %s2550_s27, %s3279_s3 }
  0x1a   :  { %p2556_p10 = pnand %p2554_p9, %p2551_p8 }
  0x1c   :  { %2559 = shalt.err (!%p2556_p10)
}
  0x1d   :  { %s2560_s13 = scalar_lea.vmem %s2827_s12, 4352  ;;  %p2565_p12 = scmp.lt.s32.totalorder %s2827_s12, %s2827_s12 }
  0x1e   :  { %p2561_p11 = scmp.ne.s32.totalorder %s2827_s12, %s2560_s13  ;;  %p2566_p13 = scmp.lt.s32.totalorder %s2560_s13, %s2560_s13 }
  0x20   :  { %p2567_p0 = por %p2566_p13, %p2565_p12 }
  0x22   :  { %p2568_p1 = pnand %p2567_p0, %p2561_p11 }
  0x24   :  { %2571 = shalt.err (!%p2568_p1)
}
  0x25   :  { %s2764_s1 = smov 1088   ;;  %s2765_s10 = smov 68  }
  0x26   :  { %66 = dma.hbm_to_vmem [thread:$0]  %s3279_s3, 4352, %s2827_s12, [#allocation9], %s2764_s1, %s2764_s1, %s2765_s10  }
  0x27   :  { %s2766_s16 = smov [#allocation11]   ;;  %s2767_s18 = smov [#allocation2]  }
  0x28   :  { %s83_s17 = sshll.u32 %s2766_s16, 4  ;;  %s26_s19 = sshll.u32 %s2767_s18, 4  ;;  %s84_s17 = int_to_ptr.vmem [resolvable:$true] %s83_s17  ;;  %s2861_s19 = int_to_ptr.vmem [resolvable:$true] %s26_s19 }
  0x29   :  { %s2572_s24 = scalar_lea.hbm %s3281_s5, 256 }
  0x2a   :  { %p2573_p2 = scmp.ne.s32.totalorder %s3281_s5, %s2572_s24  ;;  %p2576_p3 = scmp.lt.u32.totalorder %s2572_s24, %s3281_s5 }
  0x2c   :  { %p2578_p4 = pnand %p2576_p3, %p2573_p2 }
  0x2e   :  { %2581 = shalt.err (!%p2578_p4)
}
  0x2f   :  { %s2582_s3 = scalar_lea.vmem %s84_s17, 256  ;;  %p2587_p6 = scmp.lt.s32.totalorder %s84_s17, %s84_s17 }
  0x30   :  { %p2583_p5 = scmp.ne.s32.totalorder %s84_s17, %s2582_s3  ;;  %p2588_p7 = scmp.lt.s32.totalorder %s2582_s3, %s2582_s3 }
  0x32   :  { %p2589_p8 = por %p2588_p7, %p2587_p6 }
  0x34   :  { %p2590_p9 = pnand %p2589_p8, %p2583_p5 }
  0x36   :  { %2593 = shalt.err (!%p2590_p9)
}
  0x37   :  { %86 = dma.hbm_to_vmem [thread:$0]  %s3281_s5, 256, %s84_s17, [#allocation12]  }
  0x38   :  { %s2594_s13 = scalar_lea.hbm %s3276_s0, 4096 }
  0x39   :  { %p2595_p10 = scmp.ne.s32.totalorder %s3276_s0, %s2594_s13  ;;  %p2598_p11 = scmp.lt.u32.totalorder %s2594_s13, %s3276_s0 }
  0x3b   :  { %p2600_p12 = pnand %p2598_p11, %p2595_p10 }
  0x3d   :  { %2603 = shalt.err (!%p2600_p12)
}
  0x3e   :  { %s2604_s16 = scalar_lea.vmem %s2861_s19, 4096  ;;  %p2609_p0 = scmp.lt.s32.totalorder %s2861_s19, %s2861_s19 }
  0x3f   :  { %p2605_p13 = scmp.ne.s32.totalorder %s2861_s19, %s2604_s16  ;;  %p2610_p1 = scmp.lt.s32.totalorder %s2604_s16, %s2604_s16 }
  0x41   :  { %p2611_p2 = por %p2610_p1, %p2609_p0 }
  0x43   :  { %p2612_p3 = pnand %p2611_p2, %p2605_p13 }
  0x45   :  { %2615 = shalt.err (!%p2612_p3)
}
  0x46   :  { %32 = dma.hbm_to_vmem [thread:$0]  %s3276_s0, 4096, %s2861_s19, [#allocation3], %s2762_s21, %s2762_s21, %s2763_s22  }
  0x47   :  { %s2768_s18 = smov [#allocation7]   ;;  %s2769_s23 = smov [#allocation10]  }
  0x48   :  { %s51_s20 = sshll.u32 %s2768_s18, 4  ;;  %s73_s24 = sshll.u32 %s2769_s23, 4  ;;  %s52_s20 = int_to_ptr.vmem [resolvable:$true] %s51_s20  ;;  %s74_s24 = int_to_ptr.vmem [resolvable:$true] %s73_s24 }
  0x49   :  { %s2616_s27 = scalar_lea.hbm %s3278_s2, 16 }
  0x4a   :  { %p2617_p4 = scmp.ne.s32.totalorder %s3278_s2, %s2616_s27  ;;  %p2620_p5 = scmp.lt.u32.totalorder %s2616_s27, %s3278_s2 }
  0x4c   :  { %p2622_p6 = pnand %p2620_p5, %p2617_p4 }
  0x4e   :  { %2625 = shalt.err (!%p2622_p6)
}
  0x4f   :  { %s2626_s0 = scalar_lea.vmem %s52_s20, 16  ;;  %s2630_s21 = scalar_lea.vmem %s52_s20, 32 }
  0x50   :  { %p2627_p7 = scmp.ne.s32.totalorder %s52_s20, %s2626_s0  ;;  %p2631_p8 = scmp.lt.s32.totalorder %s52_s20, %s52_s20 }
  0x51   :  { %p2632_p9 = scmp.lt.s32.totalorder %s2630_s21, %s2626_s0 }
  0x53   :  { %p2633_p10 = por %p2632_p9, %p2631_p8 }
  0x55   :  { %p2634_p11 = pnand %p2633_p10, %p2627_p7 }
  0x57   :  { %2637 = shalt.err (!%p2634_p11)
}
  0x58   :  { %54 = dma.hbm_to_vmem [thread:$0]  %s3278_s2, 16, %s52_s20, [#allocation6]  }
  0x59   :  { %s2638_s13 = scalar_lea.hbm %s3280_s4, 272 }
  0x5a   :  { %p2639_p12 = scmp.ne.s32.totalorder %s3280_s4, %s2638_s13  ;;  %p2642_p13 = scmp.lt.u32.totalorder %s2638_s13, %s3280_s4 }
  0x5c   :  { %p2644_p0 = pnand %p2642_p13, %p2639_p12 }
  0x5e   :  { %2647 = shalt.err (!%p2644_p0)
}
  0x5f   :  { %s2648_s16 = scalar_lea.vmem %s74_s24, 272  ;;  %s2652_s5 = scalar_lea.vmem %s74_s24, 288 }
  0x60   :  { %p2649_p1 = scmp.ne.s32.totalorder %s74_s24, %s2648_s16  ;;  %p2653_p2 = scmp.lt.s32.totalorder %s74_s24, %s74_s24 }
  0x61   :  { %p2654_p3 = scmp.lt.s32.totalorder %s2652_s5, %s2648_s16 }
  0x63   :  { %p2655_p4 = por %p2654_p3, %p2653_p2 }
  0x65   :  { %p2656_p5 = pnand %p2655_p4, %p2649_p1 }
  0x67   :  { %2659 = shalt.err (!%p2656_p5)
}
  0x68   :  { %76 = dma.hbm_to_vmem [thread:$0]  %s3280_s4, 272, %s74_s24, [#allocation9]  }
  0x69   :  { %s2770_s18 = smov [#allocation13]   ;;  %s2660_s26 = scalar_lea.hbm %s3282_s6, 128 }
  0x6a   :  { %s93_s20 = sshll.u32 %s2770_s18, 4  ;;  %p2661_p6 = scmp.ne.s32.totalorder %s3282_s6, %s2660_s26  ;;  %s94_s20 = int_to_ptr.vmem [resolvable:$true] %s93_s20 }
  0x6b   :  { %p2664_p7 = scmp.lt.u32.totalorder %s2660_s26, %s3282_s6 }
  0x6d   :  { %p2666_p8 = pnand %p2664_p7, %p2661_p6 }
  0x6f   :  { %2669 = shalt.err (!%p2666_p8)
}
  0x70   :  { %s2670_s29 = scalar_lea.vmem %s94_s20, 128  ;;  %p2675_p10 = scmp.lt.s32.totalorder %s94_s20, %s94_s20 }
  0x71   :  { %p2671_p9 = scmp.ne.s32.totalorder %s94_s20, %s2670_s29  ;;  %p2676_p11 = scmp.lt.s32.totalorder %s2670_s29, %s2670_s29 }
  0x73   :  { %p2677_p12 = por %p2676_p11, %p2675_p10 }
  0x75   :  { %p2678_p13 = pnand %p2677_p12, %p2671_p9 }
  0x77   :  { %2681 = shalt.err (!%p2678_p13)
}
  0x78   :  { %96 = dma.hbm_to_vmem [thread:$0]  %s3282_s6, 128, %s94_s20, [#allocation12]  }
  0x79   :  { %2748 = dma.done.wait [#allocation3], 4096  }
  0x7a   :  { %2749 = vsyncadd [#allocation3], 4294963200 }
  0x7b   :  { %2750 = dma.done.wait [#allocation6], 848  }
  0x7c   :  { %2751 = vsyncadd [#allocation6], 4294966448 }
  0x7d   :  { %2752 = dma.done.wait [#allocation9], 4624  }
  0x7e   :  { %2753 = vsyncadd [#allocation9], 4294962672 }
  0x7f   :  { %2754 = dma.done.wait [#allocation12], 384  }
  0x80   :  { %2755 = vsyncadd [#allocation12], 4294966912  ;;  %v2401_v0 = vld [vmem:[#allocation5] sm:$0xff]   ;;  %v2402_v1 = vld [vmem:[#allocation5 + $0x8] sm:$0xff]   ;;  %vm402_vm0 = vcmask 818176   ;;  %vm499_vm1 = vcmask 1041408  }
  0x81   :  { %2282 = vmatprep.subr.bf16.mxu0 %v2401_v0  ;;  %2368 = vmatprep.subr.bf16.mxu1 %v2401_v0  ;;  %v2403_v2 = vld [vmem:[#allocation5 + $0x10] sm:$0xff]   ;;  %v2408_v3 = vld [vmem:[#allocation2] sm:$0xff]   ;;  %v2404_v4 = vld [vmem:[#allocation5 + $0x18] sm:$0xff]   ;;  %vm856_vm2 = vcmask 261120   ;;  %vm1176_vm3 = vcmask 1041409   ;;  %vm1178_vm4 = vcmask 1042434  }
  0x82   :  { %2283 = vmatpush3.bf16.msra.mxu0 %v2401_v0  ;;  %2375 = vmatpush3.bf16.msra.mxu1 %v2401_v0  ;;  %v2405_v5 = vld [vmem:[#allocation5 + $0x20] sm:$0xff]   ;;  %v2406_v6 = vld [vmem:[#allocation5 + $0x28] sm:$0xff]   ;;  %v2407_v7 = vld [vmem:[#allocation5 + $0x30] ss:$0 sps:$4 sm:$0x33]   ;;  %vm1180_vm5 = vcmask 1043459  }
  0x83   :  { %2284 = vmatprep.subr.bf16.mxu0 %v2402_v1  ;;  %2369 = vmatprep.subr.bf16.mxu1 %v2402_v1  ;;  %v501_v8 = vsel %vm499_vm1, %v2407_v7, 0  ;;  %v2409_v9 = vld [vmem:[#allocation2 + $0x8] sm:$0xff]   ;;  %v2410_v10 = vld [vmem:[#allocation2 + $0x10] sm:$0xff]   ;;  %v2429_v12 = vld [vmem:[#allocation2 + $0xd8] sm:$0xff]   ;;  %vm1182_vm6 = vcmask 1044484   ;;  %vm1184_vm7 = vcmask 1045509  }
  0x84   :  { %2296 = vmatprep.mubr.msk.bf16.mxu0 %vm402_vm0, %v2408_v3  ;;  %v2428_v11 = vld [vmem:[#allocation2 + $0xd0] sm:$0xff]   ;;  %v2432_v13 = vld [vmem:[#allocation2 + $0xe0] sm:$0xff]   ;;  %v2411_v14 = vld [vmem:[#allocation2 + $0x18] sm:$0xff]   ;;  %vm1186_vm8 = vcmask 1046534   ;;  %vm1188_vm9 = vcmask 1047559   ;;  %vm2773_vm10 = vmmov 0  }
  0x85   :  { %2348 = vmatprep.mubr.msk.bf16.mxu1 %vm402_vm0, %v2428_v11  ;;  %v2412_v15 = vld [vmem:[#allocation2 + $0x20] sm:$0xff]   ;;  %v2433_v16 = vld [vmem:[#allocation2 + $0xe8] sm:$0xff]   ;;  %v2436_v17 = vld [vmem:[#allocation2 + $0xf0] sm:$0xff]   ;;  %v2771_v11 = vmov 0   ;;  %s2774_s6 = smov [#allocation14]   ;;  %s2775_s21 = smov [#allocation15]  }
  0x86   :  { %2285 = vmatpush3.bf16.msra.mxu0 %v2402_v1  ;;  %2376 = vmatpush3.bf16.msra.mxu1 %v2402_v1  ;;  %v2413_v18 = vld [vmem:[#allocation2 + $0x28] sm:$0xff]   ;;  %v2437_v19 = vld [vmem:[#allocation2 + $0xf8] sm:$0xff]   ;;  %v2414_v20 = vld [vmem:[#allocation2 + $0x30] sm:$0xff]   ;;  %s2052_s0 = sshll.u32 %s2774_s6, 4  ;;  %s2062_s22 = sshll.u32 %s2775_s21, 4  ;;  %s2053_s0 = int_to_ptr.vmem [resolvable:$true] %s2052_s0  ;;  %s2063_s22 = int_to_ptr.vmem [resolvable:$true] %s2062_s22 }
  0x87   :  { %2286 = vmatprep.subr.bf16.mxu0 %v2403_v2  ;;  %2370 = vmatprep.subr.bf16.mxu1 %v2403_v2  ;;  %v2415_v21 = vld [vmem:[#allocation2 + $0x38] sm:$0xff]   ;;  %v2416_v22 = vld [vmem:[#allocation2 + $0x40] sm:$0xff]   ;;  %v2417_v23 = vld [vmem:[#allocation2 + $0x48] sm:$0xff]   ;;  %s2682_s19 = scalar_lea.vmem %s2053_s0, 1024  ;;  %p2687_p1 = scmp.lt.s32.totalorder %s2053_s0, %s2053_s0 }
  0x88   :  { %v2418_v24 = vld [vmem:[#allocation2 + $0x50] sm:$0xff]   ;;  %v2419_v25 = vld [vmem:[#allocation2 + $0x58] sm:$0xff]   ;;  %v2420_v26 = vld [vmem:[#allocation2 + $0x60] sm:$0xff]   ;;  %p2683_p0 = scmp.ne.s32.totalorder %s2053_s0, %s2682_s19  ;;  %p2688_p2 = scmp.lt.s32.totalorder %s2682_s19, %s2682_s19 }
  0x89   :  { %v2421_v27 = vld [vmem:[#allocation2 + $0x68] sm:$0xff]   ;;  %v2422_v28 = vld [vmem:[#allocation2 + $0x70] sm:$0xff]   ;;  %v2423_v29 = vld [vmem:[#allocation2 + $0x78] sm:$0xff]  }
  0x8a   :  { %2287 = vmatpush3.bf16.msra.mxu0 %v2403_v2  ;;  %2377 = vmatpush3.bf16.msra.mxu1 %v2403_v2  ;;  %v2424_v30 = vld [vmem:[#allocation2 + $0x80] sm:$0xff]   ;;  %v2425_v31 = vld [vmem:[#allocation2 + $0x88] sm:$0xff]   ;;  %v2426_v32 = vld [vmem:[#allocation2 + $0x90] sm:$0xff]   ;;  %p2689_p3 = por %p2688_p2, %p2687_p1 }
  0x8b   :  { %2288 = vmatprep.subr.bf16.mxu0 %v2404_v4  ;;  %2371 = vmatprep.subr.bf16.mxu1 %v2404_v4  ;;  %v2427_v33 = vld [vmem:[#allocation2 + $0x98] sm:$0xff]   ;;  %v2430_v34 = vld [vmem:[#allocation2 + $0xa0] sm:$0xff]   ;;  %v2431_v35 = vld [vmem:[#allocation2 + $0xa8] sm:$0xff]  }
  0x8c   :  { %v2434_v36 = vld [vmem:[#allocation2 + $0xb0] sm:$0xff]   ;;  %v2435_v37 = vld [vmem:[#allocation2 + $0xb8] sm:$0xff]   ;;  %v2438_v38 = vld [vmem:[#allocation2 + $0xc0] sm:$0xff]   ;;  %p2690_p4 = pnand %p2689_p3, %p2683_p0 }
  0x8d   :  { %v2439_v39 = vld [vmem:[#allocation2 + $0xc8] sm:$0xff]   ;;  %v2963_v40 = vld [vmem:[#allocation7] ss:$0 sm:$0xff]  ;;  %v2442_v46 = vld [vmem:[#allocation8 + $0x4] ss:$68 sps:$4 sm:$0xff]  }
  0x8e   :  { %2289 = vmatpush3.bf16.msra.mxu0 %v2404_v4  ;;  %2378 = vmatpush3.bf16.msra.mxu1 %v2404_v4  ;;  %v2440_v50 = vld [vmem:[#allocation8] ss:$68 sps:$4 sm:$0xff]   ;;  %v2445_v57 = vld [vmem:[#allocation8 + $0x8c] ss:$68 sps:$4 sm:$0xff]  }
  0x8f   :  { %2290 = vmatprep.subr.bf16.mxu0 %v2405_v5  ;;  %2372 = vmatprep.subr.bf16.mxu1 %v2405_v5  ;;  %v2443_v59 = vld [vmem:[#allocation8 + $0x88] ss:$68 sps:$4 sm:$0xff]  }
  0x92   :  { %2291 = vmatpush3.bf16.msra.mxu0 %v2405_v5  ;;  %2379 = vmatpush3.bf16.msra.mxu1 %v2405_v5 }
  0x93   :  { %2292 = vmatprep.subr.bf16.mxu0 %v2406_v6  ;;  %2373 = vmatprep.subr.bf16.mxu1 %v2406_v6 }
  0x96   :  { %2293 = vmatpush3.bf16.msra.mxu0 %v2406_v6  ;;  %2380 = vmatpush3.bf16.msra.mxu1 %v2406_v6 }
  0x97   :  { %2382 = vmatprep.subr.msk.bf16.mxu0 %vm499_vm1, %v2407_v7  ;;  %2383 = vmatprep.subr.msk.bf16.mxu1 %vm499_vm1, %v2407_v7 }
  0x9a   :  { %2295 = vmatpush3.bf16.msra.mxu0 %v501_v8  ;;  %2381 = vmatpush3.bf16.msra.mxu1 %v501_v8 }
  0x9b   :  { %1366 = vmatprep.subr.bf16.mxu1 %v2442_v46 }
  0x9d   :  { %2297 = vmatmul.mubr.msk.bf16.vlgmr.msra.gmra.mrb[0].mxu0 %vm402_vm0, %v2409_v9  ;;  %2349 = vmatmul.mubr.msk.bf16.vlgmr.msra.gmra.mrb[0].mxu1 %vm402_vm0, %v2429_v12  ;;  %v2448_v12 = vld [vmem:[#allocation8 + $0xc] ss:$68 sps:$4 sm:$0xff]  }
  0x9e   :  { %2300 = vmatprep.mubr.msk.bf16.mxu0 %vm402_vm0, %v2410_v10  ;;  %2352 = vmatprep.mubr.msk.bf16.mxu1 %vm402_vm0, %v2432_v13 }
  0x9f   :  { %1367 = vmatpush1.bf16.msra.mxu1 %v2440_v50 }
  0xa0   :  { %1368 = vmatprep.subr.bf16.mxu1 %v2445_v57 }
  0xa3   :  { %1369 = vmatpush1.bf16.msra.mxu1 %v2443_v59 }
  0xa4   :  { %1407 = vmatprep.subr.bf16.mxu1 %v2448_v12 }
  0xa5   :  { %2301 = vmatmul.mubr.msk.bf16.gmra.mrb[4].mxu0 %vm402_vm0, %v2411_v14  ;;  %2353 = vmatmul.mubr.msk.bf16.gmra.mrb[4].mxu1 %vm402_vm0, %v2433_v16 }
  0xa6   :  { %2304 = vmatprep.mubr.msk.bf16.mxu0 %vm402_vm0, %v2412_v15  ;;  %2356 = vmatprep.mubr.msk.bf16.mxu1 %vm402_vm0, %v2436_v17 }
  0xad   :  { %2305 = vmatmul.mubr.msk.bf16.gmra.mrb[8].mxu0 %vm402_vm0, %v2413_v18  ;;  %2357 = vmatmul.mubr.msk.bf16.gmra.mrb[8].mxu1 %vm402_vm0, %v2437_v19 }
  0xae   :  { %2308 = vmatprep.mubr.msk.bf16.mxu0 %vm402_vm0, %v2414_v20  ;;  %1398 = vmatprep.mubr.bf16.mxu1 %v2771_v11 }
  0xb5   :  { %2309 = vmatmul.mubr.msk.bf16.gmra.mrb[12].mxu0 %vm402_vm0, %v2415_v21 }
  0xb6   :  { %2312 = vmatprep.mubr.msk.bf16.mxu0 %vm402_vm0, %v2416_v22 }
  0xbd   :  { %2313 = vmatmul.mubr.msk.bf16.gmra.mrb[16].mxu0 %vm402_vm0, %v2417_v23 }
  0xbe   :  { %2316 = vmatprep.mubr.msk.bf16.mxu0 %vm402_vm0, %v2418_v24 }
  0xc5   :  { %2317 = vmatmul.mubr.msk.bf16.gmra.mrb[20].mxu0 %vm402_vm0, %v2419_v25 }
  0xc6   :  { %2320 = vmatprep.mubr.msk.bf16.mxu0 %vm402_vm0, %v2420_v26 }
  0xcd   :  { %2321 = vmatmul.mubr.msk.bf16.gmra.mrb[24].mxu0 %vm402_vm0, %v2421_v27 }
  0xce   :  { %2324 = vmatprep.mubr.msk.bf16.mxu0 %vm402_vm0, %v2422_v28 }
  0xd5   :  { %2325 = vmatmul.mubr.msk.bf16.gmra.mrb[28].mxu0 %vm402_vm0, %v2423_v29 }
  0xd6   :  { %2328 = vmatprep.mubr.msk.bf16.mxu0 %vm402_vm0, %v2424_v30 }
  0xdd   :  { %2329 = vmatmul.mubr.msk.bf16.gmra.mrb[32].mxu0 %vm402_vm0, %v2425_v31 }
  0xde   :  { %2332 = vmatprep.mubr.msk.bf16.mxu0 %vm402_vm0, %v2426_v32 }
  0xe5   :  { %2333 = vmatmul.mubr.msk.bf16.gmra.mrb[36].mxu0 %vm402_vm0, %v2427_v33 }
  0xe6   :  { %2336 = vmatprep.mubr.msk.bf16.mxu0 %vm402_vm0, %v2430_v34 }
  0xed   :  { %2337 = vmatmul.mubr.msk.bf16.gmra.mrb[40].mxu0 %vm402_vm0, %v2431_v35 }
  0xee   :  { %2340 = vmatprep.mubr.msk.bf16.mxu0 %vm402_vm0, %v2434_v36 }
  0xf5   :  { %2341 = vmatmul.mubr.msk.bf16.gmra.mrb[44].mxu0 %vm402_vm0, %v2435_v37 }
  0xf6   :  { %2344 = vmatprep.mubr.msk.bf16.mxu0 %vm402_vm0, %v2438_v38 }
  0xfd   :  { %2345 = vmatmul.mubr.msk.bf16.gmra.mrb[48].mxu0 %vm402_vm0, %v2439_v39 }
 0x170   :  { %v2298_v41 = vpop.f32.mrb[0].mxu0  ;;  %v2965_v42 = vpop.f32.mrb[0].mxu1 }
 0x171   :  { %v546_v43 = vadd.f32 %v2298_v41, %v2963_v40  ;;  %v537_v44 = vpop.f32.mrb[1].mxu0  ;;  %v2968_v45 = vpop.f32.mrb[1].mxu1 }
 0x172   :  { %v538_v47 = vadd.f32 %v2963_v40, %v537_v44  ;;  %v2299_v48 = vpop.f32.mrb[2].mxu0  ;;  %v2971_v49 = vpop.f32.mrb[2].mxu1 }
 0x173   :  { %v540_v51 = vpop.f32.mrb[3].mxu0  ;;  %v2973_v52 = vpop.f32.mrb[3].mxu1  ;;  %v549_v54 = vadd.f32 %v2299_v48, %v2963_v40  ;;  %v794_v56 = vmax.f32 %v546_v43, 0.0 }
 0x174   :  { %v792_v53 = vmax.f32 %v538_v47, 0.0  ;;  %v541_v55 = vadd.f32 %v2963_v40, %v540_v51 }
 0x175   :  { %v795_v61 = vmax.f32 %v549_v54, 0.0  ;;  %v860_v1 = vsel %vm856_vm2, %v794_v56, 0.0 }
 0x176   :  { %v793_v58 = vmax.f32 %v541_v55, 0.0  ;;  %v857_v60 = vsel %vm856_vm2, %v792_v53, 0.0 }
 0x177   :  { %v862_v17 = vsel %vm856_vm2, %v795_v61, 0.0 }
 0x178   :  { %v858_v62 = vsel %vm856_vm2, %v793_v58, 0.0  ;;  %v2302_v63 = vpop.f32.mrb[4].mxu0  ;;  %v2354_v0 = vpop.f32.mrb[4].mxu1 }
 0x179   :  { %v859_v2 = vadd.f32 %v858_v62, %v857_v60  ;;  %v553_v3 = vpop.f32.mrb[5].mxu0  ;;  %v761_v4 = vpop.f32.mrb[5].mxu1  ;;  %v562_v5 = vadd.f32 %v2302_v63, %v2963_v40  ;;  %v770_v8 = vadd.f32 %v2354_v0, %v2963_v40 }
 0x17a   :  { %v554_v6 = vadd.f32 %v2963_v40, %v553_v3  ;;  %v2303_v7 = vpop.f32.mrb[6].mxu0  ;;  %v762_v9 = vadd.f32 %v2963_v40, %v761_v4  ;;  %v2355_v10 = vpop.f32.mrb[6].mxu1 }
 0x17b   :  { %v861_v13 = vadd.f32 %v860_v1, %v859_v2  ;;  %v565_v14 = vadd.f32 %v2303_v7, %v2963_v40  ;;  %v556_v15 = vpop.f32.mrb[7].mxu0  ;;  %v764_v16 = vpop.f32.mrb[7].mxu1  ;;  %v773_v20 = vadd.f32 %v2355_v10, %v2963_v40  ;;  %v798_v23 = vmax.f32 %v562_v5, 0.0 }
 0x17c   :  { %v796_v18 = vmax.f32 %v554_v6, 0.0  ;;  %v557_v19 = vadd.f32 %v2963_v40, %v556_v15  ;;  %v848_v22 = vmax.f32 %v762_v9, 0.0  ;;  %v850_v26 = vmax.f32 %v770_v8, 0.0 }
 0x17d   :  { %v863_v21 = vadd.f32 %v862_v17, %v861_v13  ;;  %v799_v28 = vmax.f32 %v565_v14, 0.0  ;;  %v765_v29 = vadd.f32 %v2963_v40, %v764_v16  ;;  %v851_v32 = vmax.f32 %v773_v20, 0.0 }
 0x17e   :  { %v864_v24 = vsel %vm856_vm2, %v796_v18, 0.0  ;;  %v797_v25 = vmax.f32 %v557_v19, 0.0  ;;  %v1004_v37 = vsel %vm856_vm2, %v848_v22, 0.0  ;;  %v868_v41 = vsel %vm856_vm2, %v798_v23, 0.0 }
 0x17f   :  { %v865_v27 = vadd.f32 %v864_v24, %v863_v21  ;;  %v849_v38 = vmax.f32 %v765_v29, 0.0  ;;  %v1007_v46 = vsel %vm856_vm2, %v850_v26, 0.0  ;;  %v870_v50 = vsel %vm856_vm2, %v799_v28, 0.0 }
 0x180   :  { %v866_v30 = vsel %vm856_vm2, %v797_v25, 0.0  ;;  %v2306_v31 = vpop.f32.mrb[8].mxu0  ;;  %v2358_v33 = vpop.f32.mrb[8].mxu1  ;;  %v1009_v59 = vsel %vm856_vm2, %v851_v32, 0.0 }
 0x181   :  { %v867_v34 = vadd.f32 %v866_v30, %v865_v27  ;;  %v578_v35 = vadd.f32 %v2306_v31, %v2963_v40  ;;  %v569_v36 = vpop.f32.mrb[9].mxu0  ;;  %v777_v39 = vpop.f32.mrb[9].mxu1  ;;  %v1005_v55 = vsel %vm856_vm2, %v849_v38, 0.0  ;;  %v786_v63 = vadd.f32 %v2358_v33, %v2963_v40 }
 0x182   :  { %v570_v43 = vadd.f32 %v2963_v40, %v569_v36  ;;  %v2307_v44 = vpop.f32.mrb[10].mxu0  ;;  %v778_v47 = vadd.f32 %v2963_v40, %v777_v39  ;;  %v2359_v48 = vpop.f32.mrb[10].mxu1  ;;  %v1006_v60 = vadd.f32 %v1005_v55, %v1004_v37 }
 0x183   :  { %v869_v51 = vadd.f32 %v868_v41, %v867_v34  ;;  %v581_v53 = vadd.f32 %v2307_v44, %v2963_v40  ;;  %v572_v54 = vpop.f32.mrb[11].mxu0  ;;  %v780_v56 = vpop.f32.mrb[11].mxu1  ;;  %v802_v62 = vmax.f32 %v578_v35, 0.0  ;;  %v789_v5 = vadd.f32 %v2359_v48, %v2963_v40 }
 0x184   :  { %v800_v57 = vmax.f32 %v570_v43, 0.0  ;;  %v573_v58 = vadd.f32 %v2963_v40, %v572_v54  ;;  %v852_v0 = vmax.f32 %v778_v47, 0.0  ;;  %v1008_v2 = vadd.f32 %v1007_v46, %v1006_v60 }
 0x185   :  { %v871_v61 = vadd.f32 %v870_v50, %v869_v51  ;;  %v803_v3 = vmax.f32 %v581_v53, 0.0  ;;  %v781_v10 = vadd.f32 %v2963_v40, %v780_v56  ;;  %v881_v13 = vsel %vm856_vm2, %v802_v62, 0.0 }
 0x186   :  { %v801_v1 = vmax.f32 %v573_v58, 0.0  ;;  %v1011_v4 = vsel %vm856_vm2, %v852_v0, 0.0  ;;  %v878_v6 = vsel %vm856_vm2, %v800_v57, 0.0  ;;  %v1010_v9 = vadd.f32 %v1009_v59, %v1008_v2 }
 0x187   :  { %v872_v12 = vrot.slane %v871_v61, 4  ;;  %v854_v16 = vmax.f32 %v786_v63, 0.0  ;;  %v853_v21 = vmax.f32 %v781_v10, 0.0  ;;  %v883_v22 = vsel %vm856_vm2, %v803_v3, 0.0 }
 0x188   :  { %v879_v7 = vsel %vm856_vm2, %v801_v1, 0.0  ;;  %v2310_v8 = vpop.f32.mrb[12].mxu0  ;;  %v1012_v20 = vadd.f32 %v1011_v4, %v1010_v9  ;;  %v855_v25 = vmax.f32 %v789_v5, 0.0 }
 0x189   :  { %v880_v14 = vadd.f32 %v879_v7, %v878_v6  ;;  %v585_v15 = vpop.f32.mrb[13].mxu0  ;;  %v594_v17 = vadd.f32 %v2310_v8, %v2963_v40  ;;  %v1013_v29 = vsel %vm856_vm2, %v853_v21, 0.0  ;;  %v873_v30 = vadd.f32 %v872_v12, %v871_v61 }
 0x18a   :  { %v586_v18 = vadd.f32 %v2963_v40, %v585_v15  ;;  %v2311_v19 = vpop.f32.mrb[14].mxu0  ;;  %v1015_v32 = vsel %vm856_vm2, %v854_v16, 0.0  ;;  %v1014_v36 = vadd.f32 %v1013_v29, %v1012_v20  ;;  %v1017_v38 = vsel %vm856_vm2, %v855_v25, 0.0 }
 0x18b   :  { %v882_v23 = vadd.f32 %v881_v13, %v880_v14  ;;  %v588_v24 = vpop.f32.mrb[15].mxu0  ;;  %v597_v27 = vadd.f32 %v2311_v19, %v2963_v40  ;;  %v806_v33 = vmax.f32 %v594_v17, 0.0  ;;  %v874_v46 = vrot.slane %v873_v30, 2 }
 0x18c   :  { %v804_v26 = vmax.f32 %v586_v18, 0.0  ;;  %v589_v28 = vadd.f32 %v2963_v40, %v588_v24  ;;  %v1016_v44 = vadd.f32 %v1015_v32, %v1014_v36 }
 0x18d   :  { %v884_v31 = vadd.f32 %v883_v22, %v882_v23  ;;  %v807_v39 = vmax.f32 %v597_v27, 0.0  ;;  %v889_v50 = vsel %vm856_vm2, %v806_v33, 0.0  ;;  %v875_v62 = vadd.f32 %v874_v46, %v873_v30 }
 0x18e   :  { %v885_v34 = vsel %vm856_vm2, %v804_v26, 0.0  ;;  %v805_v35 = vmax.f32 %v589_v28, 0.0  ;;  %v3023_v55 = vadd.f32 %v1017_v38, %v1016_v44 }
 0x18f   :  { %v886_v37 = vadd.f32 %v885_v34, %v884_v31  ;;  %v891_v58 = vsel %vm856_vm2, %v807_v39, 0.0  ;;  %v876_v7 = vrot.slane %v875_v62, 1 }
 0x190   :  { %v887_v41 = vsel %vm856_vm2, %v805_v35, 0.0  ;;  %v2314_v43 = vpop.f32.mrb[16].mxu0 }
 0x191   :  { %v888_v47 = vadd.f32 %v887_v41, %v886_v37  ;;  %v601_v48 = vpop.f32.mrb[17].mxu0  ;;  %v610_v51 = vadd.f32 %v2314_v43, %v2963_v40  ;;  %v877_v23 = vadd.f32 %v876_v7, %v875_v62 }
 0x192   :  { %v602_v53 = vadd.f32 %v2963_v40, %v601_v48  ;;  %v2315_v54 = vpop.f32.mrb[18].mxu0 }
 0x193   :  { %v890_v56 = vadd.f32 %v889_v50, %v888_v47  ;;  %v604_v57 = vpop.f32.mrb[19].mxu0  ;;  %v613_v60 = vadd.f32 %v2315_v54, %v2963_v40  ;;  %v810_v0 = vmax.f32 %v610_v51, 0.0  ;;  %v1025_v34 = vpack.c.bf16 %v877_v23, %v877_v23 }
 0x194   :  { %v808_v59 = vmax.f32 %v602_v53, 0.0  ;;  %v605_v61 = vadd.f32 %v2963_v40, %v604_v57 }
 0x195   :  { %v892_v63 = vadd.f32 %v891_v58, %v890_v56  ;;  %v811_v4 = vmax.f32 %v613_v60, 0.0  ;;  %v902_v12 = vsel %vm856_vm2, %v810_v0, 0.0  ;;  %v1168_v54 = vunpack.c.l.b16 %v1025_v34 }
 0x196   :  { %v809_v1 = vmax.f32 %v605_v61, 0.0  ;;  %v899_v3 = vsel %vm856_vm2, %v808_v59, 0.0 }
 0x197   :  { %v893_v2 = vrot.slane %v892_v63, 4  ;;  %v904_v19 = vsel %vm856_vm2, %v811_v4, 0.0 }
 0x198   :  { %v900_v5 = vsel %vm856_vm2, %v809_v1, 0.0  ;;  %v2318_v6 = vpop.f32.mrb[20].mxu0 }
 0x199   :  { %v894_v8 = vadd.f32 %v893_v2, %v892_v63  ;;  %v901_v9 = vadd.f32 %v900_v5, %v899_v3  ;;  %v617_v10 = vpop.f32.mrb[21].mxu0  ;;  %v626_v13 = vadd.f32 %v2318_v6, %v2963_v40 }
 0x19a   :  { %v618_v14 = vadd.f32 %v2963_v40, %v617_v10  ;;  %v2319_v15 = vpop.f32.mrb[22].mxu0 }
 0x19b   :  { %v895_v16 = vrot.slane %v894_v8, 2  ;;  %v903_v17 = vadd.f32 %v902_v12, %v901_v9  ;;  %v620_v18 = vpop.f32.mrb[23].mxu0  ;;  %v629_v21 = vadd.f32 %v2319_v15, %v2963_v40  ;;  %v814_v26 = vmax.f32 %v626_v13, 0.0 }
 0x19c   :  { %v812_v20 = vmax.f32 %v618_v14, 0.0  ;;  %v621_v22 = vadd.f32 %v2963_v40, %v620_v18 }
 0x19d   :  { %v896_v24 = vadd.f32 %v895_v16, %v894_v8  ;;  %v905_v25 = vadd.f32 %v904_v19, %v903_v17  ;;  %v815_v31 = vmax.f32 %v629_v21, 0.0  ;;  %v910_v38 = vsel %vm856_vm2, %v814_v26, 0.0 }
 0x19e   :  { %v906_v27 = vsel %vm856_vm2, %v812_v20, 0.0  ;;  %v813_v28 = vmax.f32 %v621_v22, 0.0 }
 0x19f   :  { %v897_v29 = vrot.slane %v896_v24, 1  ;;  %v907_v30 = vadd.f32 %v906_v27, %v905_v25  ;;  %v912_v48 = vsel %vm856_vm2, %v815_v31, 0.0 }
 0x1a0   :  { %v908_v32 = vsel %vm856_vm2, %v813_v28, 0.0  ;;  %v2322_v33 = vpop.f32.mrb[24].mxu0 }
 0x1a1   :  { %v898_v35 = vadd.f32 %v897_v29, %v896_v24  ;;  %v909_v36 = vadd.f32 %v908_v32, %v907_v30  ;;  %v633_v37 = vpop.f32.mrb[25].mxu0  ;;  %v642_v39 = vadd.f32 %v2322_v33, %v2963_v40 }
 0x1a2   :  { %v634_v41 = vadd.f32 %v2963_v40, %v633_v37  ;;  %v2323_v43 = vpop.f32.mrb[26].mxu0 }
 0x1a3   :  { %v1026_v44 = vpack.c.bf16 %v898_v35, %v898_v35  ;;  %v911_v46 = vadd.f32 %v910_v38, %v909_v36  ;;  %v636_v47 = vpop.f32.mrb[27].mxu0  ;;  %v645_v51 = vadd.f32 %v2323_v43, %v2963_v40  ;;  %v818_v58 = vmax.f32 %v642_v39, 0.0 }
 0x1a4   :  { %v816_v50 = vmax.f32 %v634_v41, 0.0  ;;  %v637_v53 = vadd.f32 %v2963_v40, %v636_v47 }
 0x1a5   :  { %v1169_v56 = vunpack.c.l.b16 %v1026_v44  ;;  %v913_v57 = vadd.f32 %v912_v48, %v911_v46  ;;  %v819_v63 = vmax.f32 %v645_v51, 0.0  ;;  %v923_v5 = vsel %vm856_vm2, %v818_v58, 0.0 }
 0x1a6   :  { %v817_v59 = vmax.f32 %v637_v53, 0.0  ;;  %v920_v62 = vsel %vm856_vm2, %v816_v50, 0.0 }
 0x1a7   :  { %v1177_v60 = vsel %vm1176_vm3, %v1169_v56, %v1168_v54  ;;  %v914_v61 = vrot.slane %v913_v57, 4  ;;  %v925_v13 = vsel %vm856_vm2, %v819_v63, 0.0 }
 0x1a8   :  { %v921_v0 = vsel %vm856_vm2, %v817_v59, 0.0  ;;  %v2326_v1 = vpop.f32.mrb[28].mxu0 }
 0x1a9   :  { %v915_v2 = vadd.f32 %v914_v61, %v913_v57  ;;  %v922_v3 = vadd.f32 %v921_v0, %v920_v62  ;;  %v649_v4 = vpop.f32.mrb[29].mxu0  ;;  %v658_v6 = vadd.f32 %v2326_v1, %v2963_v40 }
 0x1aa   :  { %v650_v7 = vadd.f32 %v2963_v40, %v649_v4  ;;  %v2327_v8 = vpop.f32.mrb[30].mxu0 }
 0x1ab   :  { %v916_v9 = vrot.slane %v915_v2, 2  ;;  %v924_v10 = vadd.f32 %v923_v5, %v922_v3  ;;  %v652_v12 = vpop.f32.mrb[31].mxu0  ;;  %v661_v15 = vadd.f32 %v2327_v8, %v2963_v40  ;;  %v822_v19 = vmax.f32 %v658_v6, 0.0 }
 0x1ac   :  { %v820_v14 = vmax.f32 %v650_v7, 0.0  ;;  %v653_v16 = vadd.f32 %v2963_v40, %v652_v12 }
 0x1ad   :  { %v917_v17 = vadd.f32 %v916_v9, %v915_v2  ;;  %v926_v18 = vadd.f32 %v925_v13, %v924_v10  ;;  %v823_v24 = vmax.f32 %v661_v15, 0.0  ;;  %v931_v30 = vsel %vm856_vm2, %v822_v19, 0.0 }
 0x1ae   :  { %v927_v20 = vsel %vm856_vm2, %v820_v14, 0.0  ;;  %v821_v21 = vmax.f32 %v653_v16, 0.0 }
 0x1af   :  { %v918_v22 = vrot.slane %v917_v17, 1  ;;  %v928_v23 = vadd.f32 %v927_v20, %v926_v18  ;;  %v933_v37 = vsel %vm856_vm2, %v823_v24, 0.0 }
 0x1b0   :  { %v929_v25 = vsel %vm856_vm2, %v821_v21, 0.0  ;;  %v2330_v26 = vpop.f32.mrb[32].mxu0 }
 0x1b1   :  { %v919_v27 = vadd.f32 %v918_v22, %v917_v17  ;;  %v930_v28 = vadd.f32 %v929_v25, %v928_v23  ;;  %v665_v29 = vpop.f32.mrb[33].mxu0  ;;  %v674_v31 = vadd.f32 %v2330_v26, %v2963_v40 }
 0x1b2   :  { %v666_v32 = vadd.f32 %v2963_v40, %v665_v29  ;;  %v2331_v33 = vpop.f32.mrb[34].mxu0 }
 0x1b3   :  { %v1027_v34 = vpack.c.bf16 %v919_v27, %v919_v27  ;;  %v932_v35 = vadd.f32 %v931_v30, %v930_v28  ;;  %v668_v36 = vpop.f32.mrb[35].mxu0  ;;  %v677_v39 = vadd.f32 %v2331_v33, %v2963_v40  ;;  %v826_v46 = vmax.f32 %v674_v31, 0.0 }
 0x1b4   :  { %v824_v38 = vmax.f32 %v666_v32, 0.0  ;;  %v669_v41 = vadd.f32 %v2963_v40, %v668_v36 }
 0x1b5   :  { %v1170_v43 = vunpack.c.l.b16 %v1027_v34  ;;  %v934_v44 = vadd.f32 %v933_v37, %v932_v35  ;;  %v827_v53 = vmax.f32 %v677_v39, 0.0  ;;  %v944_v61 = vsel %vm856_vm2, %v826_v46, 0.0 }
 0x1b6   :  { %v825_v47 = vmax.f32 %v669_v41, 0.0  ;;  %v941_v51 = vsel %vm856_vm2, %v824_v38, 0.0 }
 0x1b7   :  { %v1179_v48 = vsel %vm1178_vm4, %v1170_v43, %v1177_v60  ;;  %v935_v50 = vrot.slane %v934_v44, 4  ;;  %v946_v3 = vsel %vm856_vm2, %v827_v53, 0.0 }
 0x1b8   :  { %v942_v54 = vsel %vm856_vm2, %v825_v47, 0.0  ;;  %v2334_v56 = vpop.f32.mrb[36].mxu0 }
 0x1b9   :  { %v936_v57 = vadd.f32 %v935_v50, %v934_v44  ;;  %v943_v58 = vadd.f32 %v942_v54, %v941_v51  ;;  %v681_v59 = vpop.f32.mrb[37].mxu0  ;;  %v690_v62 = vadd.f32 %v2334_v56, %v2963_v40 }
 0x1ba   :  { %v682_v63 = vadd.f32 %v2963_v40, %v681_v59  ;;  %v2335_v0 = vpop.f32.mrb[38].mxu0 }
 0x1bb   :  { %v937_v1 = vrot.slane %v936_v57, 2  ;;  %v945_v2 = vadd.f32 %v944_v61, %v943_v58  ;;  %v684_v60 = vpop.f32.mrb[39].mxu0  ;;  %v693_v5 = vadd.f32 %v2335_v0, %v2963_v40  ;;  %v830_v9 = vmax.f32 %v690_v62, 0.0 }
 0x1bc   :  { %v828_v4 = vmax.f32 %v682_v63, 0.0  ;;  %v685_v6 = vadd.f32 %v2963_v40, %v684_v60 }
 0x1bd   :  { %v938_v7 = vadd.f32 %v937_v1, %v936_v57  ;;  %v947_v8 = vadd.f32 %v946_v3, %v945_v2  ;;  %v831_v15 = vmax.f32 %v693_v5, 0.0  ;;  %v952_v21 = vsel %vm856_vm2, %v830_v9, 0.0 }
 0x1be   :  { %v948_v10 = vsel %vm856_vm2, %v828_v4, 0.0  ;;  %v829_v12 = vmax.f32 %v685_v6, 0.0 }
 0x1bf   :  { %v939_v13 = vrot.slane %v938_v7, 1  ;;  %v949_v14 = vadd.f32 %v948_v10, %v947_v8  ;;  %v954_v28 = vsel %vm856_vm2, %v831_v15, 0.0 }
 0x1c0   :  { %v950_v16 = vsel %vm856_vm2, %v829_v12, 0.0  ;;  %v2338_v17 = vpop.f32.mrb[40].mxu0 }
 0x1c1   :  { %v940_v18 = vadd.f32 %v939_v13, %v938_v7  ;;  %v951_v19 = vadd.f32 %v950_v16, %v949_v14  ;;  %v697_v20 = vpop.f32.mrb[41].mxu0  ;;  %v706_v22 = vadd.f32 %v2338_v17, %v2963_v40 }
 0x1c2   :  { %v698_v23 = vadd.f32 %v2963_v40, %v697_v20  ;;  %v2339_v24 = vpop.f32.mrb[42].mxu0 }
 0x1c3   :  { %v1028_v25 = vpack.c.bf16 %v940_v18, %v940_v18  ;;  %v953_v26 = vadd.f32 %v952_v21, %v951_v19  ;;  %v700_v27 = vpop.f32.mrb[43].mxu0  ;;  %v709_v30 = vadd.f32 %v2339_v24, %v2963_v40  ;;  %v834_v34 = vmax.f32 %v706_v22, 0.0 }
 0x1c4   :  { %v832_v29 = vmax.f32 %v698_v23, 0.0  ;;  %v701_v31 = vadd.f32 %v2963_v40, %v700_v27 }
 0x1c5   :  { %v1171_v32 = vunpack.c.l.b16 %v1028_v25  ;;  %v955_v33 = vadd.f32 %v954_v28, %v953_v26  ;;  %v835_v39 = vmax.f32 %v709_v30, 0.0  ;;  %v965_v50 = vsel %vm856_vm2, %v834_v34, 0.0 }
 0x1c6   :  { %v833_v35 = vmax.f32 %v701_v31, 0.0  ;;  %v962_v38 = vsel %vm856_vm2, %v832_v29, 0.0  ;;  %v746_v25 = vadd.f32 %v2963_v40, %v2968_v45  ;;  %v749_v30 = vadd.f32 %v2963_v40, %v2973_v52 }
 0x1c7   :  { %v1181_v36 = vsel %vm1180_vm5, %v1171_v32, %v1179_v48  ;;  %v956_v37 = vrot.slane %v955_v33, 4  ;;  %v967_v58 = vsel %vm856_vm2, %v835_v39, 0.0  ;;  %v1019_v45 = vrot.slane %v3023_v55, 4 }
 0x1c8   :  { %v963_v41 = vsel %vm856_vm2, %v833_v35, 0.0  ;;  %v2342_v43 = vpop.f32.mrb[44].mxu0  ;;  %v757_v52 = vadd.f32 %v2971_v49, %v2963_v40 }
 0x1c9   :  { %v957_v44 = vadd.f32 %v956_v37, %v955_v33  ;;  %v964_v46 = vadd.f32 %v963_v41, %v962_v38  ;;  %v713_v47 = vpop.f32.mrb[45].mxu0  ;;  %v722_v51 = vadd.f32 %v2342_v43, %v2963_v40  ;;  %v754_v37 = vadd.f32 %v2965_v42, %v2963_v40 }
 0x1ca   :  { %v714_v53 = vadd.f32 %v2963_v40, %v713_v47  ;;  %v2343_v54 = vpop.f32.mrb[46].mxu0  ;;  %v844_v38 = vmax.f32 %v746_v25, 0.0  ;;  %v845_v43 = vmax.f32 %v749_v30, 0.0  ;;  %v1020_v42 = vadd.f32 %v1019_v45, %v3023_v55  ;;  %v2458_v25 = vld [vmem:[#allocation8 + $0x18] ss:$68 sps:$4 sm:$0xff]  }
 0x1cb   :  { %v958_v56 = vrot.slane %v957_v44, 2  ;;  %v966_v57 = vadd.f32 %v965_v50, %v964_v46  ;;  %v716_v48 = vpop.f32.mrb[47].mxu0  ;;  %v725_v61 = vadd.f32 %v2343_v54, %v2963_v40  ;;  %v838_v1 = vmax.f32 %v722_v51, 0.0  ;;  %v2469_v30 = vld [vmem:[#allocation8 + $0xac] ss:$68 sps:$4 sm:$0xff]  }
 0x1cc   :  { %v836_v59 = vmax.f32 %v714_v53, 0.0  ;;  %v717_v62 = vadd.f32 %v2963_v40, %v716_v48  ;;  %v846_v50 = vmax.f32 %v754_v37, 0.0  ;;  %v990_v51 = vsel %vm856_vm2, %v844_v38, 0.0  ;;  %v2478_v37 = vld [vmem:[#allocation8 + $0x34] ss:$68 sps:$4 sm:$0xff]  }
 0x1cd   :  { %v959_v63 = vadd.f32 %v958_v56, %v957_v44  ;;  %v968_v0 = vadd.f32 %v967_v58, %v966_v57  ;;  %v839_v5 = vmax.f32 %v725_v61, 0.0  ;;  %v973_v12 = vsel %vm856_vm2, %v838_v1, 0.0  ;;  %v2476_v38 = vld [vmem:[#allocation8 + $0x30] ss:$68 sps:$4 sm:$0xff]   ;;  %v2481_v45 = vld [vmem:[#allocation8 + $0xbc] ss:$68 sps:$4 sm:$0xff]  }
 0x1ce   :  { %v969_v2 = vsel %vm856_vm2, %v836_v59, 0.0  ;;  %v837_v60 = vmax.f32 %v717_v62, 0.0  ;;  %v847_v56 = vmax.f32 %v757_v52, 0.0  ;;  %v992_v57 = vsel %vm856_vm2, %v845_v43, 0.0  ;;  %v2487_v52 = vld [vmem:[#allocation8 + $0xc4] ss:$68 sps:$4 sm:$0xff]  }
 0x1cf   :  { %v960_v3 = vrot.slane %v959_v63, 1  ;;  %v970_v4 = vadd.f32 %v969_v2, %v968_v0  ;;  %v975_v19 = vsel %vm856_vm2, %v839_v5, 0.0  ;;  %v994_v59 = vsel %vm856_vm2, %v846_v50, 0.0  ;;  %v2485_v43 = vld [vmem:[#allocation8 + $0xc0] ss:$68 sps:$4 sm:$0xff]  }
 0x1d0   :  { %v971_v6 = vsel %vm856_vm2, %v837_v60, 0.0  ;;  %v2346_v7 = vpop.f32.mrb[48].mxu0  ;;  %v996_v62 = vsel %vm856_vm2, %v847_v56, 0.0  ;;  %v1075_v50 = vlaneseq }
 0x1d1   :  { %v961_v8 = vadd.f32 %v960_v3, %v959_v63  ;;  %v972_v9 = vadd.f32 %v971_v6, %v970_v4  ;;  %v729_v10 = vpop.f32.mrb[49].mxu0  ;;  %v738_v13 = vadd.f32 %v2346_v7, %v2963_v40 }
 0x1d2   :  { %v730_v14 = vadd.f32 %v2963_v40, %v729_v10  ;;  %v2347_v15 = vpop.f32.mrb[50].mxu0 }
 0x1d3   :  { %v1029_v16 = vpack.c.bf16 %v961_v8, %v961_v8  ;;  %v974_v17 = vadd.f32 %v973_v12, %v972_v9  ;;  %v732_v18 = vpop.f32.mrb[51].mxu0  ;;  %v741_v21 = vadd.f32 %v2347_v15, %v2963_v40  ;;  %v842_v26 = vmax.f32 %v738_v13, 0.0 }
 0x1d4   :  { %v840_v20 = vmax.f32 %v730_v14, 0.0  ;;  %v733_v22 = vadd.f32 %v2963_v40, %v732_v18  ;;  %v1021_v40 = vrot.slane %v1020_v42, 2  ;;  %v2451_v18 = vld [vmem:[#allocation8 + $0x94] ss:$68 sps:$4 sm:$0xff]  }
 0x1d5   :  { %v1172_v23 = vunpack.c.l.b16 %v1029_v16  ;;  %v976_v24 = vadd.f32 %v975_v19, %v974_v17  ;;  %v843_v32 = vmax.f32 %v741_v21, 0.0  ;;  %v986_v39 = vsel %vm856_vm2, %v842_v26, 0.0  ;;  %v2446_v16 = vld [vmem:[#allocation8 + $0x8] ss:$68 sps:$4 sm:$0xff]   ;;  %v2449_v19 = vld [vmem:[#allocation8 + $0x90] ss:$68 sps:$4 sm:$0xff]  }
 0x1d6   :  { %v841_v27 = vmax.f32 %v733_v22, 0.0  ;;  %v983_v31 = vsel %vm856_vm2, %v840_v20, 0.0  ;;  %v1022_v1 = vadd.f32 %v1021_v40, %v1020_v42  ;;  %v2454_v20 = vld [vmem:[#allocation8 + $0x14] ss:$68 sps:$4 sm:$0xff]   ;;  %v2457_v22 = vld [vmem:[#allocation8 + $0x9c] ss:$68 sps:$4 sm:$0xff]  }
 0x1d7   :  { %v1183_v28 = vsel %vm1182_vm6, %v1172_v23, %v1181_v36  ;;  %v977_v29 = vrot.slane %v976_v24, 4  ;;  %v988_v44 = vsel %vm856_vm2, %v843_v32, 0.0  ;;  %v2452_v21 = vld [vmem:[#allocation8 + $0x10] ss:$68 sps:$4 sm:$0xff]   ;;  %v2455_v23 = vld [vmem:[#allocation8 + $0x98] ss:$68 sps:$4 sm:$0xff]  }
 0x1d8   :  { %v984_v33 = vsel %vm856_vm2, %v841_v27, 0.0  ;;  %v1023_v3 = vrot.slane %v1022_v1, 1  ;;  %v2463_v26 = vld [vmem:[#allocation8 + $0xa4] ss:$68 sps:$4 sm:$0xff]   ;;  %v2472_v32 = vld [vmem:[#allocation8 + $0x2c] ss:$68 sps:$4 sm:$0xff]  }
 0x1d9   :  { %v978_v34 = vadd.f32 %v977_v29, %v976_v24  ;;  %v985_v35 = vadd.f32 %v984_v33, %v983_v31  ;;  %v2460_v24 = vld [vmem:[#allocation8 + $0x1c] ss:$68 sps:$4 sm:$0xff]   ;;  %v2467_v31 = vld [vmem:[#allocation8 + $0xa8] ss:$68 sps:$4 sm:$0xff]   ;;  %v3139_v42 = vld [vmem:[#allocation10] sm:$0xff] }
 0x1da   :  { %v1024_v6 = vadd.f32 %v1023_v3, %v1022_v1  ;;  %v2461_v27 = vld [vmem:[#allocation8 + $0xa0] ss:$68 sps:$4 sm:$0xff]   ;;  %v2470_v33 = vld [vmem:[#allocation8 + $0x28] ss:$68 sps:$4 sm:$0xff]  }
 0x1db   :  { %v979_v36 = vrot.slane %v978_v34, 2  ;;  %v987_v41 = vadd.f32 %v986_v39, %v985_v35  ;;  %v2464_v29 = vld [vmem:[#allocation8 + $0x20] ss:$68 sps:$4 sm:$0xff]   ;;  %v2473_v35 = vld [vmem:[#allocation8 + $0xb0] ss:$68 sps:$4 sm:$0xff]  }
 0x1dc   :  { %v1032_v9 = vpack.c.bf16 %v1024_v6, %v1024_v6  ;;  %v2479_v39 = vld [vmem:[#allocation8 + $0xb8] ss:$68 sps:$4 sm:$0xff]  }
 0x1dd   :  { %v980_v46 = vadd.f32 %v979_v36, %v978_v34  ;;  %v989_v47 = vadd.f32 %v988_v44, %v987_v41  ;;  %v2475_v34 = vld [vmem:[#allocation8 + $0xb4] ss:$68 sps:$4 sm:$0xff]   ;;  %v2484_v36 = vld [vmem:[#allocation8 + $0x3c] ss:$68 sps:$4 sm:$0xff]  }
 0x1de   :  { %v1175_v13 = vunpack.c.l.b16 %v1032_v9  ;;  %v2482_v41 = vld [vmem:[#allocation8 + $0x38] ss:$68 sps:$4 sm:$0xff]   ;;  %v2488_v44 = vld [vmem:[#allocation8 + $0x40] ss:$68 sps:$4 sm:$0xff]  }
 0x1df   :  { %v981_v53 = vrot.slane %v980_v46, 1  ;;  %v991_v54 = vadd.f32 %v990_v51, %v989_v47  ;;  %v2489_v47 = vld [vmem:[#allocation8 + $0xc8] ss:$68 sps:$4 sm:$0xff]   ;;  %v1076_v51 = vshrl.u32 %v1075_v50, 7 }
 0x1e1   :  { %v982_v48 = vadd.f32 %v981_v53, %v980_v46  ;;  %v993_v58 = vadd.f32 %v992_v57, %v991_v54  ;;  %v2772_v46 = vmov 0.0   ;;  %v3141_v53 = vsub.s32 1, %v1076_v51 }
 0x1e2   :  { %v3157_v3 = vsub.s32 4, %v1076_v51  ;;  %v3159_v6 = vsub.s32 5, %v1076_v51 }
 0x1e3   :  { %v1030_v49 = vpack.c.bf16 %v982_v48, %v982_v48  ;;  %v995_v61 = vadd.f32 %v994_v59, %v993_v58  ;;  %v1082_v56 = vrot.slane %v3139_v42, %v3141_v53  ;;  %v3147_v59 = vsub.s32 2, %v1076_v51 }
 0x1e5   :  { %v1173_v63 = vunpack.c.l.b16 %v1030_v49  ;;  %v997_v0 = vadd.f32 %v996_v62, %v995_v61  ;;  %v3149_v61 = vsub.s32 3, %v1076_v51 }
 0x1e7   :  { %v1185_v2 = vsel %vm1184_vm7, %v1173_v63, %v1183_v28  ;;  %v998_v55 = vrot.slane %v997_v0, 4  ;;  %v2466_v28 = vld [vmem:[#allocation8 + $0x24] ss:$68 sps:$4 sm:$0xff]   ;;  %v1086_v63 = vrot.slane %v3139_v42, %v3147_v59 }
 0x1e9   :  { %v999_v60 = vadd.f32 %v998_v55, %v997_v0  ;;  %v1090_v0 = vrot.slane %v3139_v42, %v3149_v61 }
 0x1eb   :  { %v1000_v4 = vrot.slane %v999_v60, 2 }
 0x1ed   :  { %v1001_v5 = vadd.f32 %v1000_v4, %v999_v60 }
 0x1ef   :  { %v1002_v7 = vrot.slane %v1001_v5, 1 }
 0x1f1   :  { %v1003_v8 = vadd.f32 %v1002_v7, %v1001_v5 }
 0x1f3   :  { %v1031_v10 = vpack.c.bf16 %v1003_v8, %v1003_v8 }
 0x1f5   :  { %v1174_v12 = vunpack.c.l.b16 %v1031_v10 }
 0x1f7   :  { %v1187_v14 = vsel %vm1186_vm8, %v1174_v12, %v1185_v2  ;;  %v3155_v2 = vld [vmem:[#allocation11] sm:$0xff]  ;;  %v1094_v12 = vrot.slane %v3139_v42, %v3157_v3 }
 0x1f8   :  { %v1189_v15 = vsel %vm1188_vm9, %v1175_v13, %v1187_v14  ;;  %v1849_v10 = vrot.slane %v3155_v2, %v3141_v53 }
 0x1f9   :  { %v3110_v17 = vpack.c.b16 %v1189_v15, %v1189_v15  ;;  %v1098_v15 = vrot.slane %v3139_v42, %v3159_v6 }
 0x1fb   :  { %2198 = vmatmul.mubr.msk.bf16.vlgmr.msra.gmra.mrb[12].mxu1 %vm856_vm2, %v3110_v17 }
 0x1fc   :  { %1408 = vmatpush1.bf16.msra.mxu1 %v2446_v16  ;;  %1439 = vmatprep.mubr.bf16.mxu1 %v2771_v11 }
 0x1fd   :  { %1409 = vmatprep.subr.bf16.mxu1 %v2451_v18 }
 0x200   :  { %1410 = vmatpush1.bf16.msra.mxu1 %v2449_v19 }
 0x201   :  { %1448 = vmatprep.subr.bf16.mxu1 %v2454_v20 }
 0x203   :  { %2199 = vmatmul.mubr.msk.bf16.vlgmr.msra.gmra.mrb[16].mxu1 %vm856_vm2, %v3110_v17 }
 0x204   :  { %1449 = vmatpush1.bf16.msra.mxu1 %v2452_v21  ;;  %1480 = vmatprep.mubr.bf16.mxu1 %v2771_v11 }
 0x205   :  { %1450 = vmatprep.subr.bf16.mxu1 %v2457_v22 }
 0x208   :  { %1451 = vmatpush1.bf16.msra.mxu1 %v2455_v23  ;;  %v3169_v23 = vsub.s32 6, %v1076_v51 }
 0x209   :  { %1489 = vmatprep.subr.bf16.mxu1 %v2460_v24 }
 0x20b   :  { %2200 = vmatmul.mubr.msk.bf16.vlgmr.msra.gmra.mrb[20].mxu1 %vm856_vm2, %v3110_v17 }
 0x20c   :  { %1490 = vmatpush1.bf16.msra.mxu1 %v2458_v25  ;;  %1521 = vmatprep.mubr.bf16.mxu1 %v2771_v11 }
 0x20d   :  { %1491 = vmatprep.subr.bf16.mxu1 %v2463_v26  ;;  %v3171_v26 = vsub.s32 7, %v1076_v51 }
 0x210   :  { %1492 = vmatpush1.bf16.msra.mxu1 %v2461_v27 }
 0x211   :  { %1530 = vmatprep.subr.bf16.mxu1 %v2466_v28 }
 0x213   :  { %2201 = vmatmul.mubr.msk.bf16.vlgmr.msra.gmra.mrb[24].mxu1 %vm856_vm2, %v3110_v17 }
 0x214   :  { %1531 = vmatpush1.bf16.msra.mxu1 %v2464_v29  ;;  %1562 = vmatprep.mubr.bf16.mxu1 %v2771_v11  ;;  %v1853_v29 = vrot.slane %v3155_v2, %v3147_v59 }
 0x215   :  { %1532 = vmatprep.subr.bf16.mxu1 %v2469_v30 }
 0x218   :  { %1533 = vmatpush1.bf16.msra.mxu1 %v2467_v31  ;;  %v1857_v31 = vrot.slane %v3155_v2, %v3149_v61 }
 0x219   :  { %1571 = vmatprep.subr.bf16.mxu1 %v2472_v32  ;;  %v1102_v32 = vrot.slane %v3139_v42, %v3169_v23 }
 0x21b   :  { %2202 = vmatmul.mubr.msk.bf16.vlgmr.msra.gmra.mrb[28].mxu1 %vm856_vm2, %v3110_v17 }
 0x21c   :  { %1572 = vmatpush1.bf16.msra.mxu1 %v2470_v33  ;;  %1603 = vmatprep.mubr.bf16.mxu1 %v2771_v11 }
 0x21d   :  { %1573 = vmatprep.subr.bf16.mxu1 %v2475_v34 }
 0x220   :  { %1574 = vmatpush1.bf16.msra.mxu1 %v2473_v35  ;;  %v1106_v35 = vrot.slane %v3139_v42, %v3171_v26 }
 0x221   :  { %1612 = vmatprep.subr.bf16.mxu1 %v2478_v37 }
 0x223   :  { %2203 = vmatmul.mubr.msk.bf16.vlgmr.msra.gmra.mrb[32].mxu1 %vm856_vm2, %v3110_v17 }
 0x224   :  { %1613 = vmatpush1.bf16.msra.mxu1 %v2476_v38  ;;  %1644 = vmatprep.mubr.bf16.mxu1 %v2771_v11 }
 0x225   :  { %1614 = vmatprep.subr.bf16.mxu1 %v2481_v45 }
 0x228   :  { %1615 = vmatpush1.bf16.msra.mxu1 %v2479_v39 }
 0x229   :  { %1653 = vmatprep.subr.bf16.mxu1 %v2484_v36 }
 0x22b   :  { %2204 = vmatmul.mubr.msk.bf16.vlgmr.msra.gmra.mrb[36].mxu1 %vm856_vm2, %v3110_v17 }
 0x22c   :  { %1654 = vmatpush1.bf16.msra.mxu1 %v2482_v41  ;;  %1685 = vmatprep.mubr.bf16.mxu1 %v2771_v11  ;;  %v3137_v11 = vsub.s32 0, %v1076_v51  ;;  %v1861_v51 = vrot.slane %v3155_v2, %v3157_v3 }
 0x22d   :  { %1655 = vmatprep.subr.bf16.mxu1 %v2487_v52 }
 0x22e   :  { %v1078_v54 = vrot.slane %v3139_v42, %v3137_v11  ;;  %v1845_v8 = vrot.slane %v3155_v2, %v3137_v11 }
 0x230   :  { %1656 = vmatpush1.bf16.msra.mxu1 %v2485_v43 }
 0x231   :  { %2360 = vmatprep.subr.bf16.mxu1 %v2772_v46 }
 0x233   :  { %2205 = vmatmul.mubr.msk.bf16.vlgmr.msra.gmra.mrb[40].mxu1 %vm856_vm2, %v3110_v17 }
 0x234   :  { %2361 = vmatpush3.bf16.msra.mxu1 %v2488_v44  ;;  %2364 = vmatprep.mubr.msk.bf16.mxu1 %vm2773_vm10, %v2772_v46 }
 0x235   :  { %2362 = vmatprep.subr.bf16.mxu1 %v2772_v46  ;;  %v3181_v46 = vld [vmem:[#allocation10 + $0x8] sm:$0xff] }
 0x238   :  { %2363 = vmatpush3.bf16.msra.mxu1 %v2489_v47 }
 0x23b   :  { %2365 = vmatmul.mubr.msk.bf16.vlgmr.msra.gmra.mrb[44].mxu1 %vm856_vm2, %v3110_v17 }
 0x2ce   :  { %v1400_v57 = vpop.f32.mrb[12].mxu1 }
 0x2cf   :  { %v1401_v48 = vadd.f32 %v1400_v57, %v1078_v54  ;;  %v1402_v58 = vpop.f32.mrb[13].mxu1  ;;  %v1865_v54 = vrot.slane %v3155_v2, %v3159_v6 }
 0x2d0   :  { %v1403_v40 = vadd.f32 %v1402_v58, %v1082_v56  ;;  %v1404_v49 = vpop.f32.mrb[14].mxu1  ;;  %v1110_v56 = vrot.slane %v3181_v46, %v3137_v11  ;;  %v1114_v58 = vrot.slane %v3181_v46, %v3141_v53 }
 0x2d1   :  { %2490 = vtanh.f32 %v1401_v48  ;;  %v1405_v62 = vpop.f32.mrb[15].mxu1 }
 0x2d2   :  { %2492 = vtanh.f32 %v1403_v40 }
 0x2d6   :  { %v1441_v1 = vpop.f32.mrb[16].mxu1 }
 0x2d7   :  { %v1442_v55 = vadd.f32 %v1441_v1, %v1086_v63  ;;  %v1443_v60 = vpop.f32.mrb[17].mxu1 }
 0x2d8   :  { %v1444_v4 = vadd.f32 %v1443_v60, %v1090_v0  ;;  %v1445_v5 = vpop.f32.mrb[18].mxu1 }
 0x2d9   :  { %2494 = vtanh.f32 %v1442_v55  ;;  %v1446_v7 = vpop.f32.mrb[19].mxu1 }
 0x2da   :  { %2496 = vtanh.f32 %v1444_v4 }
 0x2db   :  { %v2491_v9 = vpop.eup %2490 }
 0x2dc   :  { %v2493_v13 = vpop.eup %2492  ;;  %v1750_v14 = vmul.f32 0.1, %v2491_v9 }
 0x2dd   :  { %v1751_v16 = vmul.f32 0.1, %v2493_v13 }
 0x2de   :  { %v1922_v17 = vadd.f32 %v1845_v8, %v1750_v14  ;;  %v1482_v18 = vpop.f32.mrb[20].mxu1  ;;  %v1869_v8 = vrot.slane %v3155_v2, %v3169_v23 }
 0x2df   :  { %v2224_v19 = vpack.c.bf16 %v1751_v16, %v1750_v14  ;;  %v1923_v20 = vadd.f32 %v1849_v10, %v1751_v16  ;;  %v1483_v21 = vadd.f32 %v1482_v18, %v1094_v12  ;;  %v1484_v22 = vpop.f32.mrb[21].mxu1  ;;  %v1873_v10 = vrot.slane %v3155_v2, %v3171_v26 }
 0x2e0   :  { %v1485_v24 = vadd.f32 %v1484_v22, %v1098_v15  ;;  %v1486_v25 = vpop.f32.mrb[22].mxu1  ;;  %v1118_v12 = vrot.slane %v3181_v46, %v3147_v59  ;;  %v1122_v15 = vrot.slane %v3181_v46, %v3149_v61 }
 0x2e1   :  { %1830 = vst [vmem:[#allocation14] sm:$0xff] %v2224_v19  ;;  %v2232_v27 = vpack.c.bf16 %v1923_v20, %v1922_v17  ;;  %2498 = vtanh.f32 %v1483_v21  ;;  %v1487_v28 = vpop.f32.mrb[23].mxu1  ;;  %v3199_v21 = vld [vmem:[#allocation11 + $0x8] sm:$0xff] }
 0x2e2   :  { %2500 = vtanh.f32 %v1485_v24 }
 0x2e3   :  { %v2495_v30 = vpop.eup %2494  ;;  %2002 = vst [vmem:[#allocation15] sm:$0xff] %v2232_v27 }
 0x2e4   :  { %v2497_v33 = vpop.eup %2496  ;;  %v1752_v34 = vmul.f32 0.1, %v2495_v30 }
 0x2e5   :  { %v1753_v37 = vmul.f32 0.1, %v2497_v33 }
 0x2e6   :  { %v1924_v38 = vadd.f32 %v1853_v29, %v1752_v34  ;;  %v1523_v45 = vpop.f32.mrb[24].mxu1  ;;  %v1877_v29 = vrot.slane %v3199_v21, %v3137_v11 }
 0x2e7   :  { %v2225_v39 = vpack.c.bf16 %v1753_v37, %v1752_v34  ;;  %v1925_v36 = vadd.f32 %v1857_v31, %v1753_v37  ;;  %v1524_v41 = vadd.f32 %v1523_v45, %v1102_v32  ;;  %v1525_v52 = vpop.f32.mrb[25].mxu1  ;;  %v1881_v31 = vrot.slane %v3199_v21, %v3141_v53 }
 0x2e8   :  { %v1526_v43 = vadd.f32 %v1525_v52, %v1106_v35  ;;  %v1527_v44 = vpop.f32.mrb[26].mxu1  ;;  %v1126_v32 = vrot.slane %v3181_v46, %v3157_v3  ;;  %v1130_v35 = vrot.slane %v3181_v46, %v3159_v6 }
 0x2e9   :  { %1831 = vst [vmem:[#allocation14 + $0x8] sm:$0xff] %v2225_v39  ;;  %v2233_v47 = vpack.c.bf16 %v1925_v36, %v1924_v38  ;;  %2502 = vtanh.f32 %v1524_v41  ;;  %v1528_v50 = vpop.f32.mrb[27].mxu1 }
 0x2ea   :  { %2504 = vtanh.f32 %v1526_v43 }
 0x2eb   :  { %v2499_v42 = vpop.eup %2498  ;;  %2003 = vst [vmem:[#allocation15 + $0x8] sm:$0xff] %v2233_v47 }
 0x2ec   :  { %v2501_v57 = vpop.eup %2500  ;;  %v1754_v48 = vmul.f32 0.1, %v2499_v42 }
 0x2ed   :  { %v1755_v40 = vmul.f32 0.1, %v2501_v57 }
 0x2ee   :  { %v1926_v49 = vadd.f32 %v1861_v51, %v1754_v48  ;;  %v1564_v62 = vpop.f32.mrb[28].mxu1  ;;  %v1885_v51 = vrot.slane %v3199_v21, %v3147_v59 }
 0x2ef   :  { %v2226_v63 = vpack.c.bf16 %v1755_v40, %v1754_v48  ;;  %v1927_v0 = vadd.f32 %v1865_v54, %v1755_v40  ;;  %v1565_v1 = vadd.f32 %v1564_v62, %v1110_v56  ;;  %v1566_v55 = vpop.f32.mrb[29].mxu1  ;;  %v1889_v54 = vrot.slane %v3199_v21, %v3149_v61 }
 0x2f0   :  { %v1567_v60 = vadd.f32 %v1566_v55, %v1114_v58  ;;  %v1568_v4 = vpop.f32.mrb[30].mxu1  ;;  %v1134_v56 = vrot.slane %v3181_v46, %v3169_v23  ;;  %v1138_v58 = vrot.slane %v3181_v46, %v3171_v26 }
 0x2f1   :  { %1832 = vst [vmem:[#allocation14 + $0x10] sm:$0xff] %v2226_v63  ;;  %v2234_v5 = vpack.c.bf16 %v1927_v0, %v1926_v49  ;;  %2506 = vtanh.f32 %v1565_v1  ;;  %v1569_v7 = vpop.f32.mrb[31].mxu1 }
 0x2f2   :  { %2508 = vtanh.f32 %v1567_v60 }
 0x2f3   :  { %v2503_v9 = vpop.eup %2502  ;;  %2004 = vst [vmem:[#allocation15 + $0x10] sm:$0xff] %v2234_v5 }
 0x2f4   :  { %v2505_v13 = vpop.eup %2504  ;;  %v1756_v14 = vmul.f32 0.1, %v2503_v9  ;;  %v3219_v9 = vld [vmem:[#allocation13] sm:$0xff] }
 0x2f5   :  { %v1757_v16 = vmul.f32 0.1, %v2505_v13 }
 0x2f6   :  { %v1928_v17 = vadd.f32 %v1869_v8, %v1756_v14  ;;  %v1605_v18 = vpop.f32.mrb[32].mxu1  ;;  %v1893_v8 = vrot.slane %v3199_v21, %v3157_v3 }
 0x2f7   :  { %v2227_v19 = vpack.c.bf16 %v1757_v16, %v1756_v14  ;;  %v1929_v20 = vadd.f32 %v1873_v10, %v1757_v16  ;;  %v1606_v22 = vadd.f32 %v1605_v18, %v1118_v12  ;;  %v1607_v24 = vpop.f32.mrb[33].mxu1  ;;  %v1897_v10 = vrot.slane %v3199_v21, %v3159_v6  ;;  %v2163_v14 = vld [vmem:[#allocation10 + $0x10] ss:$0 sm:$0xff] }
 0x2f8   :  { %v1608_v25 = vadd.f32 %v1607_v24, %v1122_v15  ;;  %v1609_v27 = vpop.f32.mrb[34].mxu1  ;;  %v2042_v16 = vrot.slane %v3219_v9, %v3157_v3  ;;  %v1905_v3 = vrot.slane %v3199_v21, %v3171_v26 }
 0x2f9   :  { %1833 = vst [vmem:[#allocation14 + $0x18] sm:$0xff] %v2227_v19  ;;  %v2235_v2 = vpack.c.bf16 %v1929_v20, %v1928_v17  ;;  %2510 = vtanh.f32 %v1606_v22  ;;  %v1610_v28 = vpop.f32.mrb[35].mxu1 }
 0x2fa   :  { %2512 = vtanh.f32 %v1608_v25 }
 0x2fb   :  { %v2507_v30 = vpop.eup %2506  ;;  %2005 = vst [vmem:[#allocation15 + $0x18] sm:$0xff] %v2235_v2 }
 0x2fc   :  { %v2509_v33 = vpop.eup %2508  ;;  %v1758_v34 = vmul.f32 0.1, %v2507_v30 }
 0x2fd   :  { %v1759_v37 = vmul.f32 0.1, %v2509_v33 }
 0x2fe   :  { %v1930_v38 = vadd.f32 %v1877_v29, %v1758_v34  ;;  %v1646_v45 = vpop.f32.mrb[36].mxu1  ;;  %v1901_v29 = vrot.slane %v3199_v21, %v3169_v23 }
 0x2ff   :  { %v2228_v39 = vpack.c.bf16 %v1759_v37, %v1758_v34  ;;  %v1931_v36 = vadd.f32 %v1881_v31, %v1759_v37  ;;  %v1647_v41 = vadd.f32 %v1646_v45, %v1126_v32  ;;  %v1648_v52 = vpop.f32.mrb[37].mxu1 }
 0x300   :  { %v1649_v43 = vadd.f32 %v1648_v52, %v1130_v35  ;;  %v1650_v44 = vpop.f32.mrb[38].mxu1 }
 0x301   :  { %1834 = vst [vmem:[#allocation14 + $0x20] sm:$0xff] %v2228_v39  ;;  %v2236_v47 = vpack.c.bf16 %v1931_v36, %v1930_v38  ;;  %2514 = vtanh.f32 %v1647_v41  ;;  %v1651_v50 = vpop.f32.mrb[39].mxu1 }
 0x302   :  { %2516 = vtanh.f32 %v1649_v43 }
 0x303   :  { %v2511_v42 = vpop.eup %2510  ;;  %2006 = vst [vmem:[#allocation15 + $0x20] sm:$0xff] %v2236_v47 }
 0x304   :  { %v2513_v57 = vpop.eup %2512  ;;  %v1760_v48 = vmul.f32 0.1, %v2511_v42 }
 0x305   :  { %v1761_v40 = vmul.f32 0.1, %v2513_v57 }
 0x306   :  { %v1932_v49 = vadd.f32 %v1885_v51, %v1760_v48  ;;  %v1687_v62 = vpop.f32.mrb[40].mxu1 }
 0x307   :  { %v2229_v63 = vpack.c.bf16 %v1761_v40, %v1760_v48  ;;  %v1933_v0 = vadd.f32 %v1889_v54, %v1761_v40  ;;  %v1688_v1 = vadd.f32 %v1687_v62, %v1134_v56  ;;  %v1689_v55 = vpop.f32.mrb[41].mxu1 }
 0x308   :  { %v1690_v60 = vadd.f32 %v1689_v55, %v1138_v58  ;;  %v1691_v4 = vpop.f32.mrb[42].mxu1 }
 0x309   :  { %1835 = vst [vmem:[#allocation14 + $0x28] sm:$0xff] %v2229_v63  ;;  %v2237_v5 = vpack.c.bf16 %v1933_v0, %v1932_v49  ;;  %2518 = vtanh.f32 %v1688_v1  ;;  %v1692_v7 = vpop.f32.mrb[43].mxu1 }
 0x30a   :  { %2520 = vtanh.f32 %v1690_v60 }
 0x30b   :  { %v2515_v46 = vpop.eup %2514  ;;  %2007 = vst [vmem:[#allocation15 + $0x28] sm:$0xff] %v2237_v5 }
 0x30c   :  { %v2517_v12 = vpop.eup %2516  ;;  %v1762_v13 = vmul.f32 0.1, %v2515_v46 }
 0x30d   :  { %v1763_v15 = vmul.f32 0.1, %v2517_v12 }
 0x30e   :  { %v1934_v17 = vadd.f32 %v1893_v8, %v1762_v13  ;;  %v1728_v18 = vpop.f32.mrb[44].mxu1 }
 0x30f   :  { %v2230_v19 = vpack.c.bf16 %v1763_v15, %v1762_v13  ;;  %v1935_v20 = vadd.f32 %v1897_v10, %v1763_v15  ;;  %v1729_v22 = vadd.f32 %v2163_v14, %v1728_v18  ;;  %v2366_v24 = vpop.f32.mrb[45].mxu1 }
 0x310   :  { %v1731_v25 = vpop.f32.mrb[46].mxu1 }
 0x311   :  { %1836 = vst [vmem:[#allocation14 + $0x30] sm:$0xff] %v2230_v19  ;;  %v2238_v27 = vpack.c.bf16 %v1935_v20, %v1934_v17  ;;  %v2223_v2 = vmul.f32 -1.442695, %v1729_v22  ;;  %v3225_v28 = vmul.f32 %v2042_v16, %v1729_v22  ;;  %v2367_v6 = vpop.f32.mrb[47].mxu1 }
 0x313   :  { %v2519_v30 = vpop.eup %2518  ;;  %2008 = vst [vmem:[#allocation15 + $0x30] sm:$0xff] %v2238_v27  ;;  %2522 = vpow2.f32 %v2223_v2 }
 0x314   :  { %v2521_v31 = vpop.eup %2520  ;;  %v1764_v32 = vmul.f32 0.1, %v2519_v30 }
 0x315   :  { %v1765_v33 = vmul.f32 0.1, %v2521_v31 }
 0x316   :  { %v1936_v34 = vadd.f32 %v1901_v29, %v1764_v32 }
 0x317   :  { %v2231_v35 = vpack.c.bf16 %v1765_v33, %v1764_v32  ;;  %v1937_v37 = vadd.f32 %v1905_v3, %v1765_v33 }
 0x319   :  { %1837 = vst [vmem:[#allocation14 + $0x38] sm:$0xff] %v2231_v35  ;;  %v2239_v38 = vpack.c.bf16 %v1937_v37, %v1936_v34 }
 0x31a   :  { %2693 = shalt.err (!%p2690_p4)
}
 0x31b   :  { %s2694_s13 = scalar_lea.hbm %s3283_s7, 1024 }
 0x31c   :  { %p2695_p5 = scmp.ne.s32.totalorder %s3283_s7, %s2694_s13  ;;  %p2698_p6 = scmp.lt.u32.totalorder %s2694_s13, %s3283_s7 }
 0x31e   :  { %p2700_p7 = pnand %p2698_p6, %p2695_p5 }
 0x320   :  { %2703 = shalt.err (!%p2700_p7)
}
 0x321   :  { %2055 = dma.vmem_to_hbm [thread:$0]  %s2053_s0, 1024, %s3283_s7, [#allocation4]   ;;  %2009 = vst [vmem:[#allocation15 + $0x38] sm:$0xff] %v2239_v38 }
 0x322   :  { %s2704_s2 = scalar_lea.vmem %s2063_s22, 1024  ;;  %p2709_p9 = scmp.lt.s32.totalorder %s2063_s22, %s2063_s22 }
 0x323   :  { %p2705_p8 = scmp.ne.s32.totalorder %s2063_s22, %s2704_s2  ;;  %p2710_p10 = scmp.lt.s32.totalorder %s2704_s2, %s2704_s2 }
 0x325   :  { %p2711_p11 = por %p2710_p10, %p2709_p9 }
 0x327   :  { %p2712_p12 = pnand %p2711_p11, %p2705_p8 }
 0x329   :  { %2715 = shalt.err (!%p2712_p12)
}
 0x32a   :  { %s2716_s20 = scalar_lea.hbm %s3284_s8, 1024 }
 0x32b   :  { %p2717_p13 = scmp.ne.s32.totalorder %s3284_s8, %s2716_s20  ;;  %p2720_p0 = scmp.lt.u32.totalorder %s2716_s20, %s3284_s8 }
 0x32d   :  { %p2722_p1 = pnand %p2720_p0, %p2717_p13 }
 0x32f   :  { %2725 = shalt.err (!%p2722_p1)
}
 0x330   :  { %2065 = dma.vmem_to_hbm [thread:$0]  %s2063_s22, 1024, %s3284_s8, [#allocation16]   ;;  %v2523_v23 = vpop.eup %2522  ;;  %v2020_v21 = vrot.slane %v3219_v9, %v3137_v11  ;;  %v2025_v45 = vrot.slane %v3219_v9, %v3141_v53  ;;  %v2030_v41 = vrot.slane %v3219_v9, %v3147_v59  ;;  %v2036_v52 = vrot.slane %v3219_v9, %v3149_v61 }
 0x331   :  { %v2014_v26 = vadd.f32 1.0, %v2523_v23  ;;  %s2776_s8 = smov [#allocation17]  }
 0x332   :  { %s2072_s3 = sshll.u32 %s2776_s8, 4  ;;  %s2073_s3 = int_to_ptr.vmem [resolvable:$true] %s2072_s3 }
 0x333   :  { %2524 = vrcp.f32 %v2014_v26  ;;  %s2726_s12 = scalar_lea.vmem %s2073_s3, 128  ;;  %p2731_p3 = scmp.lt.s32.totalorder %s2073_s3, %s2073_s3 }
 0x334   :  { %2526 = vtanh.f32 %v1729_v22  ;;  %p2727_p2 = scmp.ne.s32.totalorder %s2073_s3, %s2726_s12  ;;  %p2732_p4 = scmp.lt.s32.totalorder %s2726_s12, %s2726_s12 }
 0x336   :  { %p2733_p5 = por %p2732_p4, %p2731_p3 }
 0x338   :  { %p2734_p6 = pnand %p2733_p5, %p2727_p2 }
 0x33d   :  { %v2525_v39 = vpop.eup %2524 }
 0x33e   :  { %v2021_v36 = vmul.f32 %v2525_v39, %v2020_v21  ;;  %v2527_v43 = vpop.eup %2526 }
 0x33f   :  { %v2037_v50 = vmul.f32 %v2527_v43, %v2036_v52 }
 0x340   :  { %v2026_v44 = vadd.f32 %v2025_v45, %v2021_v36 }
 0x342   :  { %v2031_v47 = vmul.f32 %v2030_v41, %v2026_v44 }
 0x344   :  { %v2038_v51 = vadd.f32 %v2037_v50, %v2031_v47 }
 0x346   :  { %v2044_v11 = vadd.f32 %v3225_v28, %v2038_v51 }
 0x348   :  { %2045 = vst [vmem:[#allocation17] sm:$0xff] %v2044_v11 }
 0x349   :  { %2737 = shalt.err (!%p2734_p6)
}
 0x34a   :  { %s2738_s24 = scalar_lea.hbm %s3285_s9, 128 }
 0x34b   :  { %p2739_p7 = scmp.ne.s32.totalorder %s3285_s9, %s2738_s24  ;;  %p2742_p8 = scmp.lt.u32.totalorder %s2738_s24, %s3285_s9 }
 0x34d   :  { %p2744_p9 = pnand %p2742_p8, %p2739_p7 }
 0x34f   :  { %2747 = shalt.err (!%p2744_p9)
}
 0x350   :  { %2075 = dma.vmem_to_hbm [thread:$0]  %s2073_s3, 128, %s3285_s9, [#allocation16]  }
 0x351   :  { %2756 = dma.done.wait [#allocation4], 1024  }
 0x352   :  { %2757 = vsyncadd [#allocation4], 4294966272 }
 0x353   :  { %2758 = dma.done.wait [#allocation16], 1152  }
 0x354   :  { %2759 = vsyncadd [#allocation16], 4294966144 }
 0x355   :  { %2085 = vsyncpa [#allocation3], 1 }
 0x356   :  { %2086 = vsyncpa [#allocation6], 1 }
 0x357   :  { %2087 = vsyncpa [#allocation9], 1 }
 0x358   :  { %2088 = vsyncpa [#allocation12], 1 }
 0x359   :  { %2089 = vsyncpa [#allocation4], 1 }
 0x35a   :  { %2090 = vsyncpa [#allocation16], 1 }

</bundles_post_ra>
